<compile_context>
chip_gen: v6e
topology: v6e:2x2x1
jax: 0.10.0
libtpu: 0.0.40
codegen_flags: <defaults>
</compile_context>

<pallas_src>
import functools

import jax
import jax.numpy as jnp
from jax import lax
from jax.experimental import pallas as pl
from jax.experimental.pallas import tpu as pltpu

BN_EPS = 1e-5
KSIZE = 5
STRIDE = 2
PAD = 2


# --------------------------------------------------------------------------
# Kernel 1: fused conv (implicit im2col, 9 shifted-window matmuls) + bias +
# per-batch-element partial BN statistics.  One grid step = one batch element.
# --------------------------------------------------------------------------
def _conv_stats_kernel(xs_ref, w_ref, b_ref, y_ref, sum_ref, sumsq_ref,
                       *, oh, ow, kc, cout):
    # xs_ref block: [1, oh+2, ow+2, kc]  bf16 (space-to-depth padded input)
    # w_ref  block: [9, kc, cout]        bf16 (grouped taps, zero-padded)
    # b_ref  block: [1, cout]            f32
    acc = jnp.zeros((oh * ow, cout), jnp.float32)
    # Statically unrolled 3x3 group loop; each group is one bf16 MXU matmul
    # over the full folded channel-phase axis (no lane-offset slicing).
    for g in range(9):
        oi, oj = g // 3, g % 3
        a = xs_ref[0, pl.ds(oi, oh), pl.ds(oj, ow), :]   # [oh, ow, kc]
        a = a.reshape(oh * ow, kc)                       # layout-preserving
        acc += jnp.dot(a, w_ref[g], preferred_element_type=jnp.float32)
    yb = acc + b_ref[...]                                # [oh*ow, cout]
    y_ref[...] = yb
    # Per-batch-element partial statistics for the BatchNorm pass.
    sum_ref[...] = jnp.sum(yb, axis=0, keepdims=True).reshape(1, 1, cout)
    sumsq_ref[...] = jnp.sum(yb * yb, axis=0, keepdims=True).reshape(1, 1, cout)


# --------------------------------------------------------------------------
# Kernel 2: finalize BatchNorm (training-mode batch stats, biased var) + ReLU.
# --------------------------------------------------------------------------
def _bn_relu_kernel(y_ref, sum_ref, sumsq_ref, g_ref, b_ref, o_ref,
                    *, count, eps):
    total = jnp.sum(sum_ref[...], axis=0)       # [1, cout]
    total_sq = jnp.sum(sumsq_ref[...], axis=0)  # [1, cout]
    inv_n = 1.0 / count
    mean = total * inv_n
    var = total_sq * inv_n - mean * mean        # biased (training-mode) var
    scale = g_ref[...] * lax.rsqrt(var + eps)
    shift = b_ref[...] - mean * scale
    o_ref[...] = jnp.maximum(y_ref[...] * scale + shift, 0.0)


# --------------------------------------------------------------------------
# Wrapper
# --------------------------------------------------------------------------
def conv_block_forward(params, x_nchw):
    w, b = params["w"], params["b"]
    gamma, beta = params["gamma"], params["beta"]
    cout, cin, kh, kw = w.shape
    n, cin_x, h, wdt = x_nchw.shape
    assert cin_x == cin and kh == KSIZE and kw == KSIZE
    assert h % 2 == 0 and wdt % 2 == 0, "even spatial dims expected"
    oh, ow = h // 2, wdt // 2
    assert (oh * ow) % 8 == 0, "spatial tile must be sublane-aligned"
    hh, ww = oh + 2, ow + 2
    kc = 4 * cin                     # folded channel-phase (contraction) dim
    m = n * oh * ow

    # NCHW -> NHWC, zero-pad, stride-2 space-to-depth: the 2x2 spatial phase
    # is folded onto the channel axis so every conv tap group becomes a static
    # unit-stride VMEM window.
    x = jnp.transpose(x_nchw, (0, 2, 3, 1))
    xp = jnp.pad(x, ((0, 0), (PAD, PAD), (PAD, PAD), (0, 0)))
    xs4 = (xp.reshape(n, hh, 2, ww, 2, cin)
             .transpose(0, 1, 3, 2, 4, 5)
             .reshape(n, hh, ww, kc)
             .astype(jnp.bfloat16))

    # Weights: PyTorch [cout, cin, 5, 5] -> 9 grouped taps [9, 4*cin, cout].
    # The 5x5 kernel is zero-padded to 6x6 so that every (oi, oj) group
    # contracts the full (pi, pj, cin) axis; out-of-range taps are zeros.
    w_hwio = jnp.transpose(w, (2, 3, 1, 0))                     # [5,5,cin,cout]
    w_pad = jnp.pad(w_hwio, ((0, 1), (0, 1), (0, 0), (0, 0)))   # [6,6,cin,cout]
    wg = (w_pad.reshape(3, 2, 3, 2, cin, cout)
               .transpose(0, 2, 1, 3, 4, 5)                     # oi,oj,pi,pj,ci,co
               .reshape(9, kc, cout)
               .astype(jnp.bfloat16))
    bias2d = b.reshape(1, cout).astype(jnp.float32)

    y, psum, psumsq = pl.pallas_call(
        functools.partial(_conv_stats_kernel, oh=oh, ow=ow, kc=kc, cout=cout),
        out_shape=(
            jax.ShapeDtypeStruct((m, cout), jnp.float32),      # conv + bias
            jax.ShapeDtypeStruct((n, 1, cout), jnp.float32),   # partial sums
            jax.ShapeDtypeStruct((n, 1, cout), jnp.float32),   # partial sumsq
        ),
        grid_spec=pltpu.PrefetchScalarGridSpec(
            num_scalar_prefetch=0,
            grid=(n,),
            in_specs=[
                pl.BlockSpec((1, hh, ww, kc), lambda i: (i, 0, 0, 0)),
                pl.BlockSpec((9, kc, cout), lambda i: (0, 0, 0)),
                pl.BlockSpec((1, cout), lambda i: (0, 0)),
            ],
            out_specs=[
                pl.BlockSpec((oh * ow, cout), lambda i: (i, 0)),
                pl.BlockSpec((1, 1, cout), lambda i: (i, 0, 0)),
                pl.BlockSpec((1, 1, cout), lambda i: (i, 0, 0)),
            ],
        ),
        compiler_params=pltpu.CompilerParams(
            dimension_semantics=("parallel",)),
    )(xs4, wg, bias2d)

    # BN (batch statistics) + ReLU, tiled over rows; channels stay on lanes.
    rt = m if m <= 1024 else 512
    out2d = pl.pallas_call(
        functools.partial(_bn_relu_kernel, count=float(m), eps=BN_EPS),
        out_shape=jax.ShapeDtypeStruct((m, cout), jnp.float32),
        grid_spec=pltpu.PrefetchScalarGridSpec(
            num_scalar_prefetch=0,
            grid=(pl.cdiv(m, rt),),
            in_specs=[
                pl.BlockSpec((rt, cout), lambda i: (i, 0)),
                pl.BlockSpec((n, 1, cout), lambda i: (0, 0, 0)),
                pl.BlockSpec((n, 1, cout), lambda i: (0, 0, 0)),
                pl.BlockSpec((1, cout), lambda i: (0, 0)),
                pl.BlockSpec((1, cout), lambda i: (0, 0)),
            ],
            out_specs=pl.BlockSpec((rt, cout), lambda i: (i, 0)),
        ),
        compiler_params=pltpu.CompilerParams(
            dimension_semantics=("parallel",)),
    )(y, psum, psumsq,
      gamma.reshape(1, cout).astype(jnp.float32),
      beta.reshape(1, cout).astype(jnp.float32))

    out = out2d.reshape(n, oh, ow, cout)
    return jnp.transpose(out, (0, 3, 1, 2))            # back to NCHW


# --------------------------------------------------------------------------
# Parameters + pure-JAX reference (tolerance check)
# --------------------------------------------------------------------------
def init_params(key, cin, cout):
    k1, k2, k3, k4 = jax.random.split(key, 4)
    fan_in = float(cin * KSIZE * KSIZE)
    return {
        "w": jax.random.normal(k1, (cout, cin, KSIZE, KSIZE), jnp.float32)
             / jnp.sqrt(fan_in),
        "b": 0.1 * jax.random.normal(k2, (cout,), jnp.float32),
        "gamma": 1.0 + 0.1 * jax.random.normal(k3, (cout,), jnp.float32),
        "beta": 0.1 * jax.random.normal(k4, (cout,), jnp.float32),
    }


def _reference(params, x_nchw):
    w, b = params["w"], params["b"]
    gamma, beta = params["gamma"], params["beta"]
    y = lax.conv_general_dilated(
        x_nchw, w, window_strides=(STRIDE, STRIDE),
        padding=((PAD, PAD), (PAD, PAD)),
        dimension_numbers=("NCHW", "OIHW", "NCHW"))
    y = y + b.reshape(1, -1, 1, 1)
    mean = jnp.mean(y, axis=(0, 2, 3), keepdims=True)
    var = jnp.mean((y - mean) ** 2, axis=(0, 2, 3), keepdims=True)
    yn = (y - mean) * lax.rsqrt(var + BN_EPS)
    yn = yn * gamma.reshape(1, -1, 1, 1) + beta.reshape(1, -1, 1, 1)
    return jnp.maximum(yn, 0.0)


if __name__ == "__main__":
    key = jax.random.PRNGKey(0)
    kp, kx = jax.random.split(key)
    CIN, COUT = 4, 32
    params = init_params(kp, CIN, COUT)
    x = jax.random.normal(kx, (2, CIN, 16, 16), jnp.float32)

    out = jax.jit(conv_block_forward)(params, x)
    jax.block_until_ready(out)

    assert out.shape == (2, COUT, 8, 8)
    assert bool(jnp.all(jnp.isfinite(out)))

    ref = _reference(params, x)
    err = float(jnp.max(jnp.abs(out - ref)))
    assert err < 5e-2, f"max abs error vs f32 reference: {err}"
    print("KERNEL_OK")
</pallas_src>

<mosaic_0001>
module attributes {stable_mosaic.version = 11 : i64} {
  func.func @_bn_relu_kernel(%arg0: i32, %arg1: memref<128x32xf32, #tpu.memory_space<vmem>>, %arg2: memref<2x1x32xf32, #tpu.memory_space<vmem>>, %arg3: memref<2x1x32xf32, #tpu.memory_space<vmem>>, %arg4: memref<1x32xf32, #tpu.memory_space<vmem>>, %arg5: memref<1x32xf32, #tpu.memory_space<vmem>>, %arg6: memref<128x32xf32, #tpu.memory_space<vmem>>) attributes {dimension_semantics = [#tpu.dimension_semantics<parallel>], iteration_bounds = array<i64: 1>, scalar_prefetch = 0 : i64, scratch_operands = 0 : i64, tpu.core_type = #tpu.core_type<tc>, window_params = [{transform_indices = @transform_0, window_bounds = array<i64: 128, 32>}, {pipeline_mode = #tpu.pipeline_mode<synchronous>, transform_indices = @transform_1, window_bounds = array<i64: 2, 1, 32>}, {pipeline_mode = #tpu.pipeline_mode<synchronous>, transform_indices = @transform_2, window_bounds = array<i64: 2, 1, 32>}, {pipeline_mode = #tpu.pipeline_mode<synchronous>, transform_indices = @transform_3, window_bounds = array<i64: 1, 32>}, {pipeline_mode = #tpu.pipeline_mode<synchronous>, transform_indices = @transform_4, window_bounds = array<i64: 1, 32>}, {transform_indices = @transform_5, window_bounds = array<i64: 128, 32>}]} {
    %c0 = arith.constant 0 : index
    %c0_0 = arith.constant 0 : index
    %c0_1 = arith.constant 0 : index
    %0 = vector.load %arg2[%c0, %c0_0, %c0_1] : memref<2x1x32xf32, #tpu.memory_space<vmem>>, vector<2x1x32xf32>
    %cst = arith.constant dense<0.000000e+00> : vector<1x32xf32>
    %1 = vector.multi_reduction <add>, %0, %cst [0] : vector<2x1x32xf32> to vector<1x32xf32>
    %c0_2 = arith.constant 0 : index
    %c0_3 = arith.constant 0 : index
    %c0_4 = arith.constant 0 : index
    %2 = vector.load %arg3[%c0_2, %c0_3, %c0_4] : memref<2x1x32xf32, #tpu.memory_space<vmem>>, vector<2x1x32xf32>
    %cst_5 = arith.constant dense<0.000000e+00> : vector<1x32xf32>
    %3 = vector.multi_reduction <add>, %2, %cst_5 [0] : vector<2x1x32xf32> to vector<1x32xf32>
    %cst_6 = arith.constant 7.812500e-03 : f32
    %4 = vector.broadcast %cst_6 : f32 to vector<1x32xf32>
    %5 = arith.mulf %1, %4 : vector<1x32xf32>
    %cst_7 = arith.constant 7.812500e-03 : f32
    %6 = vector.broadcast %cst_7 : f32 to vector<1x32xf32>
    %7 = arith.mulf %3, %6 : vector<1x32xf32>
    %8 = arith.mulf %5, %5 : vector<1x32xf32>
    %9 = arith.subf %7, %8 : vector<1x32xf32>
    %c0_8 = arith.constant 0 : index
    %c0_9 = arith.constant 0 : index
    %10 = vector.load %arg4[%c0_8, %c0_9] : memref<1x32xf32, #tpu.memory_space<vmem>>, vector<1x32xf32>
    %cst_10 = arith.constant 9.99999974E-6 : f32
    %11 = vector.broadcast %cst_10 : f32 to vector<1x32xf32>
    %12 = arith.addf %9, %11 : vector<1x32xf32>
    %13 = math.rsqrt %12 : vector<1x32xf32>
    %14 = arith.mulf %10, %13 : vector<1x32xf32>
    %c0_11 = arith.constant 0 : index
    %c0_12 = arith.constant 0 : index
    %15 = vector.load %arg5[%c0_11, %c0_12] : memref<1x32xf32, #tpu.memory_space<vmem>>, vector<1x32xf32>
    %16 = arith.mulf %5, %14 : vector<1x32xf32>
    %17 = arith.subf %15, %16 : vector<1x32xf32>
    %c0_13 = arith.constant 0 : index
    %c0_14 = arith.constant 0 : index
    %18 = vector.load %arg1[%c0_13, %c0_14] : memref<128x32xf32, #tpu.memory_space<vmem>>, vector<128x32xf32>
    %19 = vector.broadcast %14 : vector<1x32xf32> to vector<128x32xf32>
    %20 = arith.mulf %18, %19 : vector<128x32xf32>
    %21 = vector.broadcast %17 : vector<1x32xf32> to vector<128x32xf32>
    %22 = arith.addf %20, %21 : vector<128x32xf32>
    %cst_15 = arith.constant 0.000000e+00 : f32
    %23 = vector.broadcast %cst_15 : f32 to vector<128x32xf32>
    %24 = arith.maximumf %22, %23 : vector<128x32xf32>
    %c0_16 = arith.constant 0 : index
    %c0_17 = arith.constant 0 : index
    %25 = vector.load %arg6[%c0_16, %c0_17] : memref<128x32xf32, #tpu.memory_space<vmem>>, vector<128x32xf32>
    tpu.vector_store %arg6[%c0_16, %c0_17], %24 {strides = array<i32>} : memref<128x32xf32, #tpu.memory_space<vmem>>, vector<128x32xf32>,
    return
  }
  func.func @transform_0(%arg0: i32) -> (i32, i32) {
    %c0_i32 = arith.constant 0 : i32
    %c0_i32_0 = arith.constant 0 : i32
    return %arg0, %c0_i32 : i32, i32
  }
  func.func @transform_1(%arg0: i32) -> (i32, i32, i32) {
    %c0_i32 = arith.constant 0 : i32
    %c0_i32_0 = arith.constant 0 : i32
    %c0_i32_1 = arith.constant 0 : i32
    %c0_i32_2 = arith.constant 0 : i32
    return %c0_i32, %c0_i32_0, %c0_i32_1 : i32, i32, i32
  }
  func.func @transform_2(%arg0: i32) -> (i32, i32, i32) {
    %c0_i32 = arith.constant 0 : i32
    %c0_i32_0 = arith.constant 0 : i32
    %c0_i32_1 = arith.constant 0 : i32
    %c0_i32_2 = arith.constant 0 : i32
    return %c0_i32, %c0_i32_0, %c0_i32_1 : i32, i32, i32
  }
  func.func @transform_3(%arg0: i32) -> (i32, i32) {
    %c0_i32 = arith.constant 0 : i32
    %c0_i32_0 = arith.constant 0 : i32
    %c0_i32_1 = arith.constant 0 : i32
    return %c0_i32, %c0_i32_0 : i32, i32
  }
  func.func @transform_4(%arg0: i32) -> (i32, i32) {
    %c0_i32 = arith.constant 0 : i32
    %c0_i32_0 = arith.constant 0 : i32
    %c0_i32_1 = arith.constant 0 : i32
    return %c0_i32, %c0_i32_0 : i32, i32
  }
  func.func @transform_5(%arg0: i32) -> (i32, i32) {
    %c0_i32 = arith.constant 0 : i32
    %c0_i32_0 = arith.constant 0 : i32
    return %arg0, %c0_i32 : i32, i32
  }
}

module attributes {stable_mosaic.version = 11 : i64} {
  func.func @_conv_stats_kernel(%arg0: i32, %arg1: memref<1x10x10x16xbf16, #tpu.memory_space<vmem>>, %arg2: memref<9x16x32xbf16, #tpu.memory_space<vmem>>, %arg3: memref<1x32xf32, #tpu.memory_space<vmem>>, %arg4: memref<64x32xf32, #tpu.memory_space<vmem>>, %arg5: memref<1x1x32xf32, #tpu.memory_space<vmem>>, %arg6: memref<1x1x32xf32, #tpu.memory_space<vmem>>) attributes {dimension_semantics = [#tpu.dimension_semantics<parallel>], iteration_bounds = array<i64: 2>, scalar_prefetch = 0 : i64, scratch_operands = 0 : i64, tpu.core_type = #tpu.core_type<tc>, window_params = [{transform_indices = @transform_0, window_bounds = array<i64: 1, 10, 10, 16>}, {pipeline_mode = #tpu.pipeline_mode<synchronous>, transform_indices = @transform_1, window_bounds = array<i64: 9, 16, 32>}, {pipeline_mode = #tpu.pipeline_mode<synchronous>, transform_indices = @transform_2, window_bounds = array<i64: 1, 32>}, {transform_indices = @transform_3, window_bounds = array<i64: 64, 32>}, {transform_indices = @transform_4, window_bounds = array<i64: 1, 1, 32>}, {transform_indices = @transform_5, window_bounds = array<i64: 1, 1, 32>}]} {
    %cst = arith.constant 0.000000e+00 : f32
    %0 = vector.broadcast %cst : f32 to vector<64x32xf32>
    %c0 = arith.constant 0 : index
    %c0_0 = arith.constant 0 : index
    %c0_1 = arith.constant 0 : index
    %c0_2 = arith.constant 0 : index
    %1 = vector.load %arg1[%c0, %c0_0, %c0_1, %c0_2] : memref<1x10x10x16xbf16, #tpu.memory_space<vmem>>, vector<1x8x8x16xbf16>
    %2 = vector.shape_cast %1 : vector<1x8x8x16xbf16> to vector<8x8x16xbf16>
    %3 = vector.shape_cast %2 : vector<8x8x16xbf16> to vector<64x16xbf16>
    %c0_3 = arith.constant 0 : index
    %c0_4 = arith.constant 0 : index
    %c0_5 = arith.constant 0 : index
    %4 = vector.load %arg2[%c0_3, %c0_4, %c0_5] : memref<9x16x32xbf16, #tpu.memory_space<vmem>>, vector<1x16x32xbf16>
    %5 = vector.shape_cast %4 : vector<1x16x32xbf16> to vector<16x32xbf16>
    %cst_6 = arith.constant dense<0.000000e+00> : vector<64x32xf32>
    %6 = tpu.matmul %3, %5, %cst_6 {dimension_numbers = #tpu.dot_dimension_numbers<[1], [0], [0], [1], [0, 0, 1, 1], [], []>} : vector<64x16xbf16>, vector<16x32xbf16>, vector<64x32xf32> -> vector<64x32xf32>
    %7 = arith.addf %0, %6 : vector<64x32xf32>
    %c0_7 = arith.constant 0 : index
    %c0_8 = arith.constant 0 : index
    %c1 = arith.constant 1 : index
    %c0_9 = arith.constant 0 : index
    %8 = vector.load %arg1[%c0_7, %c0_8, %c1, %c0_9] : memref<1x10x10x16xbf16, #tpu.memory_space<vmem>>, vector<1x8x8x16xbf16>
    %9 = vector.shape_cast %8 : vector<1x8x8x16xbf16> to vector<8x8x16xbf16>
    %10 = vector.shape_cast %9 : vector<8x8x16xbf16> to vector<64x16xbf16>
    %c1_10 = arith.constant 1 : index
    %c0_11 = arith.constant 0 : index
    %c0_12 = arith.constant 0 : index
    %11 = vector.load %arg2[%c1_10, %c0_11, %c0_12] : memref<9x16x32xbf16, #tpu.memory_space<vmem>>, vector<1x16x32xbf16>
    %12 = vector.shape_cast %11 : vector<1x16x32xbf16> to vector<16x32xbf16>
    %cst_13 = arith.constant dense<0.000000e+00> : vector<64x32xf32>
    %13 = tpu.matmul %10, %12, %cst_13 {dimension_numbers = #tpu.dot_dimension_numbers<[1], [0], [0], [1], [0, 0, 1, 1], [], []>} : vector<64x16xbf16>, vector<16x32xbf16>, vector<64x32xf32> -> vector<64x32xf32>
    %14 = arith.addf %7, %13 : vector<64x32xf32>
    %c0_14 = arith.constant 0 : index
    %c0_15 = arith.constant 0 : index
    %c2 = arith.constant 2 : index
    %c0_16 = arith.constant 0 : index
    %15 = vector.load %arg1[%c0_14, %c0_15, %c2, %c0_16] : memref<1x10x10x16xbf16, #tpu.memory_space<vmem>>, vector<1x8x8x16xbf16>
    %16 = vector.shape_cast %15 : vector<1x8x8x16xbf16> to vector<8x8x16xbf16>
    %17 = vector.shape_cast %16 : vector<8x8x16xbf16> to vector<64x16xbf16>
    %c2_17 = arith.constant 2 : index
    %c0_18 = arith.constant 0 : index
    %c0_19 = arith.constant 0 : index
    %18 = vector.load %arg2[%c2_17, %c0_18, %c0_19] : memref<9x16x32xbf16, #tpu.memory_space<vmem>>, vector<1x16x32xbf16>
    %19 = vector.shape_cast %18 : vector<1x16x32xbf16> to vector<16x32xbf16>
    %cst_20 = arith.constant dense<0.000000e+00> : vector<64x32xf32>
    %20 = tpu.matmul %17, %19, %cst_20 {dimension_numbers = #tpu.dot_dimension_numbers<[1], [0], [0], [1], [0, 0, 1, 1], [], []>} : vector<64x16xbf16>, vector<16x32xbf16>, vector<64x32xf32> -> vector<64x32xf32>
    %21 = arith.addf %14, %20 : vector<64x32xf32>
    %c0_21 = arith.constant 0 : index
    %c1_22 = arith.constant 1 : index
    %c0_23 = arith.constant 0 : index
    %c0_24 = arith.constant 0 : index
    %22 = vector.load %arg1[%c0_21, %c1_22, %c0_23, %c0_24] : memref<1x10x10x16xbf16, #tpu.memory_space<vmem>>, vector<1x8x8x16xbf16>
    %23 = vector.shape_cast %22 : vector<1x8x8x16xbf16> to vector<8x8x16xbf16>
    %24 = vector.shape_cast %23 : vector<8x8x16xbf16> to vector<64x16xbf16>
    %c3 = arith.constant 3 : index
    %c0_25 = arith.constant 0 : index
    %c0_26 = arith.constant 0 : index
    %25 = vector.load %arg2[%c3, %c0_25, %c0_26] : memref<9x16x32xbf16, #tpu.memory_space<vmem>>, vector<1x16x32xbf16>
    %26 = vector.shape_cast %25 : vector<1x16x32xbf16> to vector<16x32xbf16>
    %cst_27 = arith.constant dense<0.000000e+00> : vector<64x32xf32>
    %27 = tpu.matmul %24, %26, %cst_27 {dimension_numbers = #tpu.dot_dimension_numbers<[1], [0], [0], [1], [0, 0, 1, 1], [], []>} : vector<64x16xbf16>, vector<16x32xbf16>, vector<64x32xf32> -> vector<64x32xf32>
    %28 = arith.addf %21, %27 : vector<64x32xf32>
    %c0_28 = arith.constant 0 : index
    %c1_29 = arith.constant 1 : index
    %c1_30 = arith.constant 1 : index
    %c0_31 = arith.constant 0 : index
    %29 = vector.load %arg1[%c0_28, %c1_29, %c1_30, %c0_31] : memref<1x10x10x16xbf16, #tpu.memory_space<vmem>>, vector<1x8x8x16xbf16>
    %30 = vector.shape_cast %29 : vector<1x8x8x16xbf16> to vector<8x8x16xbf16>
    %31 = vector.shape_cast %30 : vector<8x8x16xbf16> to vector<64x16xbf16>
    %c4 = arith.constant 4 : index
    %c0_32 = arith.constant 0 : index
    %c0_33 = arith.constant 0 : index
    %32 = vector.load %arg2[%c4, %c0_32, %c0_33] : memref<9x16x32xbf16, #tpu.memory_space<vmem>>, vector<1x16x32xbf16>
    %33 = vector.shape_cast %32 : vector<1x16x32xbf16> to vector<16x32xbf16>
    %cst_34 = arith.constant dense<0.000000e+00> : vector<64x32xf32>
    %34 = tpu.matmul %31, %33, %cst_34 {dimension_numbers = #tpu.dot_dimension_numbers<[1], [0], [0], [1], [0, 0, 1, 1], [], []>} : vector<64x16xbf16>, vector<16x32xbf16>, vector<64x32xf32> -> vector<64x32xf32>
    %35 = arith.addf %28, %34 : vector<64x32xf32>
    %c0_35 = arith.constant 0 : index
    %c1_36 = arith.constant 1 : index
    %c2_37 = arith.constant 2 : index
    %c0_38 = arith.constant 0 : index
    %36 = vector.load %arg1[%c0_35, %c1_36, %c2_37, %c0_38] : memref<1x10x10x16xbf16, #tpu.memory_space<vmem>>, vector<1x8x8x16xbf16>
    %37 = vector.shape_cast %36 : vector<1x8x8x16xbf16> to vector<8x8x16xbf16>
    %38 = vector.shape_cast %37 : vector<8x8x16xbf16> to vector<64x16xbf16>
    %c5 = arith.constant 5 : index
    %c0_39 = arith.constant 0 : index
    %c0_40 = arith.constant 0 : index
    %39 = vector.load %arg2[%c5, %c0_39, %c0_40] : memref<9x16x32xbf16, #tpu.memory_space<vmem>>, vector<1x16x32xbf16>
    %40 = vector.shape_cast %39 : vector<1x16x32xbf16> to vector<16x32xbf16>
    %cst_41 = arith.constant dense<0.000000e+00> : vector<64x32xf32>
    %41 = tpu.matmul %38, %40, %cst_41 {dimension_numbers = #tpu.dot_dimension_numbers<[1], [0], [0], [1], [0, 0, 1, 1], [], []>} : vector<64x16xbf16>, vector<16x32xbf16>, vector<64x32xf32> -> vector<64x32xf32>
    %42 = arith.addf %35, %41 : vector<64x32xf32>
    %c0_42 = arith.constant 0 : index
    %c2_43 = arith.constant 2 : index
    %c0_44 = arith.constant 0 : index
    %c0_45 = arith.constant 0 : index
    %43 = vector.load %arg1[%c0_42, %c2_43, %c0_44, %c0_45] : memref<1x10x10x16xbf16, #tpu.memory_space<vmem>>, vector<1x8x8x16xbf16>
    %44 = vector.shape_cast %43 : vector<1x8x8x16xbf16> to vector<8x8x16xbf16>
    %45 = vector.shape_cast %44 : vector<8x8x16xbf16> to vector<64x16xbf16>
    %c6 = arith.constant 6 : index
    %c0_46 = arith.constant 0 : index
    %c0_47 = arith.constant 0 : index
    %46 = vector.load %arg2[%c6, %c0_46, %c0_47] : memref<9x16x32xbf16, #tpu.memory_space<vmem>>, vector<1x16x32xbf16>
    %47 = vector.shape_cast %46 : vector<1x16x32xbf16> to vector<16x32xbf16>
    %cst_48 = arith.constant dense<0.000000e+00> : vector<64x32xf32>
    %48 = tpu.matmul %45, %47, %cst_48 {dimension_numbers = #tpu.dot_dimension_numbers<[1], [0], [0], [1], [0, 0, 1, 1], [], []>} : vector<64x16xbf16>, vector<16x32xbf16>, vector<64x32xf32> -> vector<64x32xf32>
    %49 = arith.addf %42, %48 : vector<64x32xf32>
    %c0_49 = arith.constant 0 : index
    %c2_50 = arith.constant 2 : index
    %c1_51 = arith.constant 1 : index
    %c0_52 = arith.constant 0 : index
    %50 = vector.load %arg1[%c0_49, %c2_50, %c1_51, %c0_52] : memref<1x10x10x16xbf16, #tpu.memory_space<vmem>>, vector<1x8x8x16xbf16>
    %51 = vector.shape_cast %50 : vector<1x8x8x16xbf16> to vector<8x8x16xbf16>
    %52 = vector.shape_cast %51 : vector<8x8x16xbf16> to vector<64x16xbf16>
    %c7 = arith.constant 7 : index
    %c0_53 = arith.constant 0 : index
    %c0_54 = arith.constant 0 : index
    %53 = vector.load %arg2[%c7, %c0_53, %c0_54] : memref<9x16x32xbf16, #tpu.memory_space<vmem>>, vector<1x16x32xbf16>
    %54 = vector.shape_cast %53 : vector<1x16x32xbf16> to vector<16x32xbf16>
    %cst_55 = arith.constant dense<0.000000e+00> : vector<64x32xf32>
    %55 = tpu.matmul %52, %54, %cst_55 {dimension_numbers = #tpu.dot_dimension_numbers<[1], [0], [0], [1], [0, 0, 1, 1], [], []>} : vector<64x16xbf16>, vector<16x32xbf16>, vector<64x32xf32> -> vector<64x32xf32>
    %56 = arith.addf %49, %55 : vector<64x32xf32>
    %c0_56 = arith.constant 0 : index
    %c2_57 = arith.constant 2 : index
    %c2_58 = arith.constant 2 : index
    %c0_59 = arith.constant 0 : index
    %57 = vector.load %arg1[%c0_56, %c2_57, %c2_58, %c0_59] : memref<1x10x10x16xbf16, #tpu.memory_space<vmem>>, vector<1x8x8x16xbf16>
    %58 = vector.shape_cast %57 : vector<1x8x8x16xbf16> to vector<8x8x16xbf16>
    %59 = vector.shape_cast %58 : vector<8x8x16xbf16> to vector<64x16xbf16>
    %c8 = arith.constant 8 : index
    %c0_60 = arith.constant 0 : index
    %c0_61 = arith.constant 0 : index
    %60 = vector.load %arg2[%c8, %c0_60, %c0_61] : memref<9x16x32xbf16, #tpu.memory_space<vmem>>, vector<1x16x32xbf16>
    %61 = vector.shape_cast %60 : vector<1x16x32xbf16> to vector<16x32xbf16>
    %cst_62 = arith.constant dense<0.000000e+00> : vector<64x32xf32>
    %62 = tpu.matmul %59, %61, %cst_62 {dimension_numbers = #tpu.dot_dimension_numbers<[1], [0], [0], [1], [0, 0, 1, 1], [], []>} : vector<64x16xbf16>, vector<16x32xbf16>, vector<64x32xf32> -> vector<64x32xf32>
    %63 = arith.addf %56, %62 : vector<64x32xf32>
    %c0_63 = arith.constant 0 : index
    %c0_64 = arith.constant 0 : index
    %64 = vector.load %arg3[%c0_63, %c0_64] : memref<1x32xf32, #tpu.memory_space<vmem>>, vector<1x32xf32>
    %65 = vector.broadcast %64 : vector<1x32xf32> to vector<64x32xf32>
    %66 = arith.addf %63, %65 : vector<64x32xf32>
    %c0_65 = arith.constant 0 : index
    %c0_66 = arith.constant 0 : index
    %67 = vector.load %arg4[%c0_65, %c0_66] : memref<64x32xf32, #tpu.memory_space<vmem>>, vector<64x32xf32>
    tpu.vector_store %arg4[%c0_65, %c0_66], %66 {strides = array<i32>} : memref<64x32xf32, #tpu.memory_space<vmem>>, vector<64x32xf32>,
    %cst_67 = arith.constant dense<0.000000e+00> : vector<32xf32>
    %68 = vector.multi_reduction <add>, %66, %cst_67 [0] : vector<64x32xf32> to vector<32xf32>
    %69 = vector.shape_cast %68 : vector<32xf32> to vector<1x32xf32>
    %70 = vector.shape_cast %69 : vector<1x32xf32> to vector<1x1x32xf32>
    %c0_68 = arith.constant 0 : index
    %c0_69 = arith.constant 0 : index
    %c0_70 = arith.constant 0 : index
    %71 = vector.load %arg5[%c0_68, %c0_69, %c0_70] : memref<1x1x32xf32, #tpu.memory_space<vmem>>, vector<1x1x32xf32>
    tpu.vector_store %arg5[%c0_68, %c0_69, %c0_70], %70 {strides = array<i32>} : memref<1x1x32xf32, #tpu.memory_space<vmem>>, vector<1x1x32xf32>,
    %72 = arith.mulf %66, %66 : vector<64x32xf32>
    %cst_71 = arith.constant dense<0.000000e+00> : vector<32xf32>
    %73 = vector.multi_reduction <add>, %72, %cst_71 [0] : vector<64x32xf32> to vector<32xf32>
    %74 = vector.shape_cast %73 : vector<32xf32> to vector<1x32xf32>
    %75 = vector.shape_cast %74 : vector<1x32xf32> to vector<1x1x32xf32>
    %c0_72 = arith.constant 0 : index
    %c0_73 = arith.constant 0 : index
    %c0_74 = arith.constant 0 : index
    %76 = vector.load %arg6[%c0_72, %c0_73, %c0_74] : memref<1x1x32xf32, #tpu.memory_space<vmem>>, vector<1x1x32xf32>
    tpu.vector_store %arg6[%c0_72, %c0_73, %c0_74], %75 {strides = array<i32>} : memref<1x1x32xf32, #tpu.memory_space<vmem>>, vector<1x1x32xf32>,
    return
  }
  func.func @transform_0(%arg0: i32) -> (i32, i32, i32, i32) {
    %c0_i32 = arith.constant 0 : i32
    %c0_i32_0 = arith.constant 0 : i32
    %c0_i32_1 = arith.constant 0 : i32
    %c0_i32_2 = arith.constant 0 : i32
    return %arg0, %c0_i32, %c0_i32_0, %c0_i32_1 : i32, i32, i32, i32
  }
  func.func @transform_1(%arg0: i32) -> (i32, i32, i32) {
    %c0_i32 = arith.constant 0 : i32
    %c0_i32_0 = arith.constant 0 : i32
    %c0_i32_1 = arith.constant 0 : i32
    %c0_i32_2 = arith.constant 0 : i32
    return %c0_i32, %c0_i32_0, %c0_i32_1 : i32, i32, i32
  }
  func.func @transform_2(%arg0: i32) -> (i32, i32) {
    %c0_i32 = arith.constant 0 : i32
    %c0_i32_0 = arith.constant 0 : i32
    %c0_i32_1 = arith.constant 0 : i32
    return %c0_i32, %c0_i32_0 : i32, i32
  }
  func.func @transform_3(%arg0: i32) -> (i32, i32) {
    %c0_i32 = arith.constant 0 : i32
    %c0_i32_0 = arith.constant 0 : i32
    return %arg0, %c0_i32 : i32, i32
  }
  func.func @transform_4(%arg0: i32) -> (i32, i32, i32) {
    %c0_i32 = arith.constant 0 : i32
    %c0_i32_0 = arith.constant 0 : i32
    %c0_i32_1 = arith.constant 0 : i32
    return %arg0, %c0_i32, %c0_i32_0 : i32, i32, i32
  }
  func.func @transform_5(%arg0: i32) -> (i32, i32, i32) {
    %c0_i32 = arith.constant 0 : i32
    %c0_i32_0 = arith.constant 0 : i32
    %c0_i32_1 = arith.constant 0 : i32
    return %arg0, %c0_i32, %c0_i32_0 : i32, i32, i32
  }
}

</mosaic_0001>

<bundles_post_ra>
// kernel: conv_block_forward.3
= control target key start
LH: loop header
LB: loop body
LE: loop exit
PB: predicated region body
PF: predicated region fallthrough
CT: control target
= control target key end

     0   :  { %vm23_vm0 = vcmask 253952   ;;  %s297_s0 = inlined_call_operand.vmem [shape: f32[128,32], index: 0, kind: input, shape index: {}]   ;;  %s298_s1 = inlined_call_operand.vmem [shape: f32[2,1,32], index: 1, kind: input, shape index: {}]   ;;  %s299_s2 = inlined_call_operand.vmem [shape: f32[2,1,32], index: 2, kind: input, shape index: {}]   ;;  %s300_s3 = inlined_call_operand.vmem [shape: f32[1,32], index: 3, kind: input, shape index: {}]   ;;  %s301_s4 = inlined_call_operand.vmem [shape: f32[1,32], index: 4, kind: input, shape index: {}]   ;;  %s302_s5 = inlined_call_operand.hbm [shape: f32[128,32], index: 5, kind: output, shape index: {}]  }
   0x1   :  { %v21_v0 = vld [vmem:[%s298_s1] sm:$0x1]  ;;  %v22_v1 = vld [vmem:[%s298_s1 + $0x1] sm:$0x1] }
   0x2   :  { %v24_v2 = vsel %vm23_vm0, %v21_v0, 0.0  ;;  %v25_v3 = vsel %vm23_vm0, %v22_v1, 0.0  ;;  %v27_v4 = vld [vmem:[%s299_s2] sm:$0x1]  ;;  %v28_v5 = vld [vmem:[%s299_s2 + $0x1] sm:$0x1] }
   0x3   :  { %v26_v6 = vadd.f32 %v25_v3, %v24_v2  ;;  %v29_v7 = vsel %vm23_vm0, %v27_v4, 0.0  ;;  %v30_v8 = vsel %vm23_vm0, %v28_v5, 0.0 }
   0x4   :  { %v31_v9 = vadd.f32 %v30_v8, %v29_v7 }
   0x5   :  { %v32_v10 = vmul.f32 0.0078125, %v26_v6 }
   0x6   :  { %v33_v11 = vmul.f32 0.0078125, %v31_v9 }
   0x7   :  { %v34_v12 = vmul.f32 %v32_v10, %v32_v10 }
   0x9   :  { %v35_v13 = vsub.f32 %v33_v11, %v34_v12 }
   0xa   :  { %10 = vsyncpa [#allocation3], 0  ;;  %v60_v15 = vlaneseq  ;;  %v36_v17 = vld [vmem:[%s300_s3] sm:$0x1]  ;;  %v44_v23 = vld [vmem:[%s297_s0 + $0x8] sm:$0xff]  ;;  %vm119_vm1 = vcmask 261120  }
   0xb   :  { %v37_v14 = vadd.f32 1e-05, %v35_v13  ;;  %v40_v21 = vld [vmem:[%s301_s4] sm:$0x1]  ;;  %v45_v24 = vld [vmem:[%s297_s0 + $0x10] sm:$0xff]  ;;  %v46_v25 = vld [vmem:[%s297_s0 + $0x18] sm:$0xff] }
   0xc   :  { %v61_v16 = vshrl.u32 %v60_v15, 7  ;;  %v43_v22 = vld [vmem:[%s297_s0] sm:$0xff]  ;;  %v48_v29 = vld [vmem:[%s297_s0 + $0x28] sm:$0xff]  ;;  %v49_v30 = vld [vmem:[%s297_s0 + $0x30] sm:$0xff] }
   0xd   :  { %155 = vrsqrt.f32 %v37_v14  ;;  %v47_v26 = vld [vmem:[%s297_s0 + $0x20] sm:$0xff]  ;;  %v50_v31 = vld [vmem:[%s297_s0 + $0x38] sm:$0xff]  ;;  %v52_v33 = vld [vmem:[%s297_s0 + $0x48] sm:$0xff] }
   0xe   :  { %v62_v18 = vsub.s32 0, %v61_v16  ;;  %v51_v32 = vld [vmem:[%s297_s0 + $0x40] sm:$0xff]  ;;  %v53_v34 = vld [vmem:[%s297_s0 + $0x50] sm:$0xff]  ;;  %v54_v39 = vld [vmem:[%s297_s0 + $0x58] sm:$0xff] }
   0xf   :  { %v55_v40 = vld [vmem:[%s297_s0 + $0x60] sm:$0xff]  ;;  %v56_v41 = vld [vmem:[%s297_s0 + $0x68] sm:$0xff]  ;;  %v57_v2 = vld [vmem:[%s297_s0 + $0x70] sm:$0xff] }
  0x10   :  { %v58_v3 = vld [vmem:[%s297_s0 + $0x78] sm:$0xff]  ;;  %s179_s0 = smov [#allocation2]  }
  0x11   :  { %s141_s6 = sshll.u32 %s179_s0, 4  ;;  %s142_s6 = int_to_ptr.vmem [resolvable:$true] %s141_s6 }
  0x12   :  { %s157_s7 = scalar_lea.vmem %s142_s6, 2048  ;;  %p162_p1 = scmp.lt.s32.totalorder %s142_s6, %s142_s6 }
  0x13   :  { %p158_p0 = scmp.ne.s32.totalorder %s142_s6, %s157_s7  ;;  %p163_p2 = scmp.lt.s32.totalorder %s157_s7, %s157_s7 }
  0x15   :  { %p164_p3 = por %p163_p2, %p162_p1 }
  0x17   :  { %p165_p4 = pnand %p164_p3, %p158_p0 }
  0x1a   :  { %v156_v19 = vpop.eup %155 }
  0x1b   :  { %v39_v20 = vmul.f32 %v156_v19, %v36_v17 }
  0x1d   :  { %v41_v27 = vmul.f32 %v39_v20, %v32_v10  ;;  %v63_v28 = vrot.slane %v39_v20, %v62_v18 }
  0x1f   :  { %v42_v35 = vsub.f32 %v40_v21, %v41_v27  ;;  %v65_v36 = vmul.f32 %v63_v28, %v43_v22  ;;  %v66_v37 = vmul.f32 %v63_v28, %v44_v23  ;;  %v67_v38 = vmul.f32 %v63_v28, %v45_v24 }
  0x20   :  { %v68_v42 = vmul.f32 %v63_v28, %v46_v25  ;;  %v69_v43 = vmul.f32 %v63_v28, %v47_v26  ;;  %v70_v44 = vmul.f32 %v63_v28, %v48_v29  ;;  %v71_v45 = vmul.f32 %v63_v28, %v49_v30 }
  0x21   :  { %v85_v46 = vrot.slane %v42_v35, %v62_v18  ;;  %v72_v47 = vmul.f32 %v63_v28, %v50_v31  ;;  %v73_v48 = vmul.f32 %v63_v28, %v51_v32  ;;  %v74_v49 = vmul.f32 %v63_v28, %v52_v33 }
  0x22   :  { %v75_v50 = vmul.f32 %v63_v28, %v53_v34  ;;  %v76_v51 = vmul.f32 %v63_v28, %v54_v39  ;;  %v77_v52 = vmul.f32 %v63_v28, %v55_v40  ;;  %v78_v53 = vmul.f32 %v63_v28, %v56_v41 }
  0x23   :  { %v87_v54 = vadd.f32 %v85_v46, %v65_v36  ;;  %v88_v55 = vadd.f32 %v85_v46, %v66_v37  ;;  %v89_v56 = vadd.f32 %v85_v46, %v67_v38  ;;  %v90_v57 = vadd.f32 %v85_v46, %v68_v42 }
  0x24   :  { %v91_v58 = vadd.f32 %v85_v46, %v69_v43  ;;  %v92_v59 = vadd.f32 %v85_v46, %v70_v44  ;;  %v93_v60 = vadd.f32 %v85_v46, %v71_v45  ;;  %v94_v61 = vadd.f32 %v85_v46, %v72_v47 }
  0x25   :  { %v103_v62 = vmax.f32 %v87_v54, 0.0  ;;  %v104_v63 = vmax.f32 %v88_v55, 0.0  ;;  %v105_v0 = vmax.f32 %v89_v56, 0.0  ;;  %v106_v1 = vmax.f32 %v90_v57, 0.0 }
  0x26   :  { %v107_v4 = vmax.f32 %v91_v58, 0.0  ;;  %v108_v5 = vmax.f32 %v92_v59, 0.0  ;;  %v109_v6 = vmax.f32 %v93_v60, 0.0  ;;  %v110_v7 = vmax.f32 %v94_v61, 0.0 }
  0x27   :  { %120 = vst.msk [vmem:[#allocation2] sm:$0xff] %vm119_vm1, %v103_v62  ;;  %121 = vst.msk [vmem:[#allocation2 + $0x8] sm:$0xff] %vm119_vm1, %v104_v63  ;;  %v95_v8 = vadd.f32 %v85_v46, %v73_v48  ;;  %v96_v9 = vadd.f32 %v85_v46, %v74_v49  ;;  %v97_v10 = vadd.f32 %v85_v46, %v75_v50 }
  0x28   :  { %122 = vst.msk [vmem:[#allocation2 + $0x10] sm:$0xff] %vm119_vm1, %v105_v0  ;;  %123 = vst.msk [vmem:[#allocation2 + $0x18] sm:$0xff] %vm119_vm1, %v106_v1  ;;  %v98_v11 = vadd.f32 %v85_v46, %v76_v51  ;;  %v99_v12 = vadd.f32 %v85_v46, %v77_v52  ;;  %v100_v13 = vadd.f32 %v85_v46, %v78_v53 }
  0x29   :  { %124 = vst.msk [vmem:[#allocation2 + $0x20] sm:$0xff] %vm119_vm1, %v107_v4  ;;  %125 = vst.msk [vmem:[#allocation2 + $0x28] sm:$0xff] %vm119_vm1, %v108_v5  ;;  %v79_v14 = vmul.f32 %v63_v28, %v57_v2  ;;  %v80_v15 = vmul.f32 %v63_v28, %v58_v3  ;;  %v111_v16 = vmax.f32 %v95_v8, 0.0  ;;  %v112_v17 = vmax.f32 %v96_v9, 0.0 }
  0x2a   :  { %126 = vst.msk [vmem:[#allocation2 + $0x30] sm:$0xff] %vm119_vm1, %v109_v6  ;;  %127 = vst.msk [vmem:[#allocation2 + $0x38] sm:$0xff] %vm119_vm1, %v110_v7  ;;  %v113_v18 = vmax.f32 %v97_v10, 0.0  ;;  %v114_v19 = vmax.f32 %v98_v11, 0.0  ;;  %v115_v20 = vmax.f32 %v99_v12, 0.0  ;;  %v116_v21 = vmax.f32 %v100_v13, 0.0 }
  0x2b   :  { %v101_v22 = vadd.f32 %v85_v46, %v79_v14  ;;  %v102_v23 = vadd.f32 %v85_v46, %v80_v15  ;;  %128 = vst.msk [vmem:[#allocation2 + $0x40] sm:$0xff] %vm119_vm1, %v111_v16  ;;  %129 = vst.msk [vmem:[#allocation2 + $0x48] sm:$0xff] %vm119_vm1, %v112_v17 }
  0x2c   :  { %130 = vst.msk [vmem:[#allocation2 + $0x50] sm:$0xff] %vm119_vm1, %v113_v18  ;;  %131 = vst.msk [vmem:[#allocation2 + $0x58] sm:$0xff] %vm119_vm1, %v114_v19 }
  0x2d   :  { %132 = vst.msk [vmem:[#allocation2 + $0x60] sm:$0xff] %vm119_vm1, %v115_v20  ;;  %133 = vst.msk [vmem:[#allocation2 + $0x68] sm:$0xff] %vm119_vm1, %v116_v21  ;;  %v117_v24 = vmax.f32 %v101_v22, 0.0  ;;  %v118_v25 = vmax.f32 %v102_v23, 0.0 }
  0x2f   :  { %134 = vst.msk [vmem:[#allocation2 + $0x70] sm:$0xff] %vm119_vm1, %v117_v24  ;;  %135 = vst.msk [vmem:[#allocation2 + $0x78] sm:$0xff] %vm119_vm1, %v118_v25 }
  0x30   :  { %168 = shalt.err (!%p165_p4)
}
  0x31   :  { %s180_s8 = smov 128   ;;  %s181_s3 = smov 8  }
  0x32   :  { %147 = dma.vmem_to_hbm [thread:$0]  %s142_s6, 2048, %s302_s5, [#allocation3], %s180_s8, %s180_s8, %s181_s3  }
  0x33   :  { %177 = dma.done.wait [#allocation3], 2048  }
  0x34   :  { %178 = vsyncadd [#allocation3], 4294965248 }
  0x35   :  { %151 = vsyncpa [#allocation3], 1 }

// kernel: conv_block_forward.2
= control target key start
LH: loop header
LB: loop body
LE: loop exit
PB: predicated region body
PF: predicated region fallthrough
CT: control target
= control target key end

     0   :  { %s2366_s18 = smov 0   ;;  %s2935_s0 = inlined_call_operand.vmem [shape: bf16[2,10,10,16], index: 0, kind: input, shape index: {}]   ;;  %s2936_s1 = inlined_call_operand.vmem [shape: bf16[9,16,32], index: 1, kind: input, shape index: {}]   ;;  %s2937_s2 = inlined_call_operand.vmem [shape: f32[1,32], index: 2, kind: input, shape index: {}]   ;;  %s2938_s3 = inlined_call_operand.vmem [shape: f32[128,32], index: 3, kind: output, shape index: {0}]   ;;  %s2939_s4 = inlined_call_operand.vmem [shape: f32[2,1,32], index: 4, kind: output, shape index: {1}]   ;;  %s2940_s5 = inlined_call_operand.vmem [shape: f32[2,1,32], index: 5, kind: output, shape index: {2}]  }
   0x1 LB: > { %s2372_s19 = sadd.s32 4294967295, %s2334_s18   ;;  %p1969_p0 = scmp.ge.s32.totalorder %s2334_s18, 1  ;;  %s2334_s18 = sphi %s2366_s18, %s16_s18  }
   0x2   : > { %p192_p1 = scmp.lt.s32.totalorder %s2334_s18, 3 }
   0x4   : > { %p193_p2 = pnand %p1969_p0, %p192_p1 }
   0x5   : > { %p226_p3 = scmp.lt.s32.totalorder (!%p193_p2), %s2372_s19, 1  ;;  %s1971_s20 = sshll.u32 (!%p193_p2), %s2372_s19, 3 }
   0x6   : > { %196 = sbr.rel (%p193_p2) target bundleno = 335 (0x14f), region = 32  ;;  %p2853_p4 = scmp.lt.s32.totalorder (!%p193_p2), %s1971_s20, 15 }
   0xb   : > { %v2307_v0 = vld [vmem:[%s2936_s1 + $0x8] sm:$0xff]   ;;  %v2383_v1 = vld [vmem:[%s2936_s1] sm:$0xff]   ;;  %s2386_s24 = scalar_select %p226_p3, %s2372_s19, 1  ;;  %v2391_v2 = vld [vmem:[%s2936_s1 + $0x10] sm:$0xff]   ;;  %vm262_vm0 = vsmask.f32 3328 }
   0xc   : > { %2296 = vmatprep.subr.bf16.mxu1 %v2307_v0  ;;  %2206 = vmatprep.subr.bf16.mxu0 %v2307_v0  ;;  %vm263_vm1 = vsmask.f32 7440  ;;  %vm398_vm2 = vcmask 130048   ;;  %vm603_vm4 = vcmask 1042432   ;;  %vm604_vm5 = vcmask 1046532   ;;  %s2947_s20 = smov (!%p2853_p4, %s1971_s20), 15 }
   0xd   : > { %2297 = vmatpush3.bf16.msra.mxu1 %v2307_v0  ;;  %2207 = vmatpush3.bf16.msra.mxu0 %v2307_v0  ;;  %s2298_s27 = smul.u32 80, %s2386_s24  ;;  %vm2442_vm3 = vmor %vm262_vm0, %vm263_vm1  ;;  %s1972_s19 = sshll.u32 %s2947_s20, 3  ;;  %vm1797_vm7 = vcmask 261120   ;;  %vm1827_vm8 = vcmask 253952  }
   0xe   : > { %2216 = vmatprep.subr.bf16.mxu1 %v2383_v1  ;;  %2226 = vmatprep.subr.bf16.mxu0 %v2391_v2  ;;  %vm2508_vm6 = vmor %vm603_vm4, %vm604_vm5  ;;  %s242_s8 = scalar_lea.vmem %s2940_s5, %s2386_s24 }
   0xf   : > { %s2399_s30 = scalar_lea.vmem %s2935_s0, %s2298_s27  ;;  %s2876_s27 = scalar_lea.vmem %s2938_s3, %s1972_s19 }
  0x10   : > { %v2402_v3 = vld [vmem:[%s2399_s30] sm:$0xf]  ;;  %v2405_v4 = vld [vmem:[%s2399_s30 + $0x8] sm:$0xf]  ;;  %v2408_v5 = vld [vmem:[%s2399_s30 + $0x4] sm:$0x1] }
  0x11   : > { %v2411_v6 = vld [vmem:[%s2399_s30 + $0xc] sm:$0x1]  ;;  %v266_v7 = vshrl.u32 %v2402_v3, 16  ;;  %v269_v8 = vshll.u32 %v2402_v3, 16  ;;  %v275_v9 = vshll.u32 %v2408_v5, 16  ;;  %v280_v10 = vshrl.u32 %v2405_v4, 16 }
  0x12   : > { %v283_v11 = vshll.u32 %v2405_v4, 16  ;;  %v289_v12 = vshll.u32 %v2411_v6, 16  ;;  %v608_v13 = vrot.slane %v2408_v5, 5  ;;  %v612_v14 = vrot.slane %v2411_v6, 5  ;;  %v2422_v15 = vld [vmem:[%s2399_s30 + $0x20] sm:$0xf] }
  0x13   : > { %v268_v16 = vrot.slane %v266_v7, 4  ;;  %v271_v17 = vrot.slane %v269_v8, 5  ;;  %v277_v18 = vrot.slane %v275_v9, 5  ;;  %v282_v19 = vrot.slane %v280_v10, 4  ;;  %v2425_v20 = vld [vmem:[%s2399_s30 + $0x28] sm:$0xf] }
  0x14   : > { %v285_v21 = vrot.slane %v283_v11, 5  ;;  %v291_v22 = vrot.slane %v289_v12, 5  ;;  %v2428_v23 = vld [vmem:[%s2399_s30 + $0x24] sm:$0x1]  ;;  %v2431_v24 = vld [vmem:[%s2399_s30 + $0x2c] sm:$0x1]  ;;  %v1984_v25 = vcombine.low %v2402_v3, %v2405_v4  ;;  %v1986_v26 = vcombine.low %v2422_v15, %v2425_v20 }
  0x15   : > { %v272_v27 = vor.u32 %v271_v17, %v268_v16  ;;  %v322_v28 = vshrl.u32 %v2422_v15, 16  ;;  %v325_v29 = vshll.u32 %v2422_v15, 16  ;;  %v331_v30 = vshll.u32 %v2428_v23, 16  ;;  %v2450_v36 = vld [vmem:[%s2399_s30 + $0x10] sm:$0xf] }
  0x16   : > { %v286_v32 = vor.u32 %v285_v21, %v282_v19  ;;  %v336_v33 = vshrl.u32 %v2425_v20, 16  ;;  %v339_v34 = vshll.u32 %v2425_v20, 16  ;;  %v345_v35 = vshll.u32 %v2431_v24, 16  ;;  %v2453_v41 = vld [vmem:[%s2399_s30 + $0x18] sm:$0xf] }
  0x17   : > { %v273_v37 = vrot.slane %v272_v27, 4  ;;  %v324_v38 = vrot.slane %v322_v28, 4  ;;  %v327_v39 = vrot.slane %v325_v29, 5  ;;  %v333_v40 = vrot.slane %v331_v30, 5  ;;  %v2456_v46 = vld [vmem:[%s2399_s30 + $0x14] sm:$0x1] }
  0x18   : > { %v287_v42 = vrot.slane %v286_v32, 4  ;;  %v338_v43 = vrot.slane %v336_v33, 4  ;;  %v341_v44 = vrot.slane %v339_v34, 5  ;;  %v347_v45 = vrot.slane %v345_v35, 5  ;;  %v2465_v53 = vld [vmem:[%s2399_s30 + $0x1c] sm:$0x1] }
  0x19   : > { %v278_v47 = vsel %vm2442_vm3, %v273_v37, %v277_v18  ;;  %v328_v48 = vor.u32 %v327_v39, %v324_v38  ;;  %v624_v49 = vrot.slane %v2428_v23, 5  ;;  %v628_v50 = vrot.slane %v2431_v24, 5  ;;  %v2472_v60 = vld [vmem:[%s2399_s30 + $0x30] sm:$0xf]  ;;  %v2476_v7 = vld [vmem:[%s2399_s30 + $0x38] sm:$0xf] }
  0x1a   : > { %v292_v51 = vsel %vm2442_vm3, %v287_v42, %v291_v22  ;;  %v342_v52 = vor.u32 %v341_v44, %v338_v43  ;;  %v294_v54 = vshrl.u32 %v2450_v36, 16  ;;  %v297_v55 = vshll.u32 %v2450_v36, 16  ;;  %v2483_v12 = vld [vmem:[%s2399_s30 + $0x34] sm:$0x1]  ;;  %v2489_v21 = vld [vmem:[%s2399_s30 + $0x3c] sm:$0x1] }
  0x1b   : > { %v1975_v56 = vcombine.low %v278_v47, %v292_v51  ;;  %v329_v57 = vrot.slane %v328_v48, 4  ;;  %v303_v58 = vshll.u32 %v2456_v46, 16  ;;  %v308_v59 = vshrl.u32 %v2453_v41, 16  ;;  %v579_v22 = vld [vmem:[%s2399_s30] sm:$0xe] }
  0x1c   : > { %v343_v61 = vrot.slane %v342_v52, 4  ;;  %v296_v62 = vrot.slane %v294_v54, 4  ;;  %v299_v63 = vrot.slane %v297_v55, 5  ;;  %v311_v0 = vshll.u32 %v2453_v41, 16  ;;  %v580_v32 = vld [vmem:[%s2399_s30 + $0x8] sm:$0xe] }
  0x1d   : > { %2208 = vmatprep.mubr.msk.bf16.mxu0 %vm398_vm2, %v1975_v56  ;;  %v334_v8 = vsel %vm2442_vm3, %v329_v57, %v333_v40  ;;  %v305_v9 = vrot.slane %v303_v58, 5  ;;  %v310_v10 = vrot.slane %v308_v59, 4  ;;  %v317_v11 = vshll.u32 %v2465_v53, 16  ;;  %v581_v38 = vld [vmem:[%s2399_s30 + $0x10] sm:$0xe] }
  0x1e   : > { %v348_v16 = vsel %vm2442_vm3, %v343_v61, %v347_v45  ;;  %v300_v17 = vor.u32 %v299_v63, %v296_v62  ;;  %v313_v18 = vrot.slane %v311_v0, 5  ;;  %v616_v19 = vrot.slane %v2456_v46, 5  ;;  %v582_v44 = vld [vmem:[%s2399_s30 + $0x18] sm:$0xe]  ;;  %v583_v45 = vld [vmem:[%s2399_s30 + $0x20] sm:$0xe] }
  0x1f   : > { %v1977_v27 = vcombine.low %v334_v8, %v348_v16  ;;  %v319_v28 = vrot.slane %v317_v11, 5  ;;  %v620_v29 = vrot.slane %v2465_v53, 5  ;;  %v350_v30 = vshrl.u32 %v2472_v60, 16  ;;  %v584_v62 = vld [vmem:[%s2399_s30 + $0x28] sm:$0xe] }
  0x20   : > { %v301_v33 = vrot.slane %v300_v17, 4  ;;  %v314_v34 = vor.u32 %v313_v18, %v310_v10  ;;  %v353_v35 = vshll.u32 %v2472_v60, 16  ;;  %v359_v37 = vshll.u32 %v2483_v12, 16  ;;  %v2313_v10 = vld [vmem:[%s2936_s1 + $0x20] sm:$0xff]   ;;  %v585_v11 = vld [vmem:[%s2399_s30 + $0x30] sm:$0xe] }
  0x21   : > { %2212 = vmatprep.mubr.msk.bf16.mxu1 %vm398_vm2, %v1977_v27  ;;  %v352_v39 = vrot.slane %v350_v30, 4  ;;  %v364_v40 = vshrl.u32 %v2476_v7, 16  ;;  %v367_v42 = vshll.u32 %v2476_v7, 16  ;;  %v373_v43 = vshll.u32 %v2489_v21, 16  ;;  %v586_v5 = vld [vmem:[%s2399_s30 + $0x38] sm:$0xe] }
  0x22   : > { %v306_v46 = vsel %vm2442_vm3, %v301_v33, %v305_v9  ;;  %v315_v47 = vrot.slane %v314_v34, 4  ;;  %v355_v48 = vrot.slane %v353_v35, 5  ;;  %v361_v51 = vrot.slane %v359_v37, 5  ;;  %v2546_v34 = vld [vmem:[%s2399_s30 + $0xc] sm:$0x1] }
  0x23   : > { %v366_v53 = vrot.slane %v364_v40, 4  ;;  %v369_v54 = vrot.slane %v367_v42, 5  ;;  %v375_v55 = vrot.slane %v373_v43, 5  ;;  %v1993_v56 = vrot.slane %v579_v22, 9  ;;  %v2033_v37 = vld [vmem:[%s2399_s30 + $0x10] sm:$0xf] }
  0x24   : > { %v320_v57 = vsel %vm2442_vm3, %v315_v47, %v319_v28  ;;  %v356_v58 = vor.u32 %v355_v48, %v352_v39  ;;  %v1994_v59 = vrot.slane %v580_v32, 9  ;;  %v1985_v61 = vcombine.low %v2450_v36, %v2453_v41  ;;  %v2316_v15 = vld [vmem:[%s2399_s30 + $0x8] ss:$8 sps:$4 sm:$0xff]  }
  0x25   : > { %v1976_v63 = vcombine.low %v306_v46, %v320_v57  ;;  %v370_v0 = vor.u32 %v369_v54, %v366_v53  ;;  %v609_v8 = vsel %vm2508_vm6, %v1993_v56, %v608_v13  ;;  %v1995_v9 = vrot.slane %v581_v38, 9  ;;  %v2562_v38 = vld [vmem:[%s2399_s30 + $0x14] sm:$0x1] }
  0x26   : > { %v357_v16 = vrot.slane %v356_v58, 4  ;;  %v613_v17 = vsel %vm2508_vm6, %v1994_v59, %v612_v14  ;;  %v1996_v18 = vrot.slane %v582_v44, 9  ;;  %v1997_v22 = vrot.slane %v583_v45, 9  ;;  %v2035_v44 = vld [vmem:[%s2399_s30 + $0x18] sm:$0xf]  ;;  %v2591_v59 = vld [vmem:[%s2936_s1 + $0x30] sm:$0xff]  }
  0x27   : > { %2209 = vmatmul.mubr.msk.bf16.vlgmr.msra.gmra.mxu0 %vm398_vm2, %v1976_v63  ;;  %v371_v13 = vrot.slane %v370_v0, 4  ;;  %v2003_v27 = vcombine.low %v609_v8, %v613_v17  ;;  %v617_v28 = vsel %vm2508_vm6, %v1995_v9, %v616_v19  ;;  %v1998_v30 = vrot.slane %v584_v62, 9  ;;  %v2031_v19 = vld [vmem:[%s2399_s30 + $0x8] sm:$0xf]  ;;  %v2567_v45 = vld [vmem:[%s2399_s30 + $0x1c] sm:$0x1] }
  0x28   : > { %v362_v6 = vsel %vm2442_vm3, %v357_v16, %v361_v51  ;;  %2227 = vmatpush3.bf16.msra.mxu0 %v2391_v2  ;;  %v621_v14 = vsel %vm2508_vm6, %v1996_v18, %v620_v29  ;;  %v625_v32 = vsel %vm2508_vm6, %v1997_v22, %v624_v49  ;;  %v1987_v33 = vcombine.low %v2472_v60, %v2476_v7  ;;  %v2554_v2 = vld [vmem:[%s2936_s1 + $0x18] sm:$0xff]   ;;  %v2586_v58 = vld [vmem:[%s2399_s30 + $0x24] sm:$0x1]  ;;  %v2039_v9 = vld [vmem:[%s2399_s30 + $0x28] sm:$0xf] }
  0x29   : > { %v376_v35 = vsel %vm2442_vm3, %v371_v13, %v375_v55  ;;  %2228 = vmatprep.mubr.msk.bf16.mxu0 %vm398_vm2, %v2003_v27  ;;  %v2004_v23 = vcombine.low %v617_v28, %v621_v14  ;;  %2246 = vmatprep.subr.bf16.mxu0 %v2313_v10  ;;  %v629_v49 = vsel %vm2508_vm6, %v1998_v30, %v628_v50  ;;  %v1999_v29 = vrot.slane %v585_v11, 9  ;;  %v2037_v50 = vld [vmem:[%s2399_s30 + $0x20] sm:$0xf]  ;;  %v2602_v16 = vld [vmem:[%s2936_s1 + $0x28] sm:$0xff]   ;;  %v2060_v7 = vld [vmem:[%s2399_s30 + $0x18] sm:$0xe] }
  0x2a   : > { %v1978_v39 = vcombine.low %v362_v6, %v376_v35  ;;  %v2005_v40 = vcombine.low %v625_v32, %v629_v49  ;;  %v632_v42 = vrot.slane %v2483_v12, 5  ;;  %v2000_v43 = vrot.slane %v586_v5, 9  ;;  %v2606_v5 = vld [vmem:[%s2399_s30 + $0x2c] sm:$0x1] }
  0x2b   : > { %v636_v46 = vrot.slane %v2489_v21, 5  ;;  %v884_v47 = vshrl.u32 %v2031_v19, 16  ;;  %v887_v24 = vshll.u32 %v2031_v19, 16  ;;  %v893_v48 = vshll.u32 %v2546_v34, 16 }
  0x2c   : > { %2213 = vmatmul.mubr.msk.bf16.vlgmr.msra.gmra.mxu1 %vm398_vm2, %v1978_v39  ;;  %v2575_v51 = vsel %vm2508_vm6, %v1999_v29, %v632_v42  ;;  %v898_v53 = vshrl.u32 %v2033_v37, 16  ;;  %v901_v12 = vshll.u32 %v2033_v37, 16  ;;  %v907_v54 = vshll.u32 %v2562_v38, 16 }
  0x2d   : > { %2217 = vmatpush3.bf16.msra.mxu1 %v2383_v1  ;;  %2218 = vmatprep.mubr.msk.bf16.mxu1 %vm398_vm2, %v1984_v25  ;;  %v637_v21 = vsel %vm2508_vm6, %v2000_v43, %v636_v46  ;;  %v886_v55 = vrot.slane %v884_v47, 4  ;;  %v889_v56 = vrot.slane %v887_v24, 5  ;;  %v895_v57 = vrot.slane %v893_v48, 5  ;;  %v2629_v47 = vld [vmem:[%s2399_s30 + $0x3c] sm:$0x1] }
  0x2e   : > { %2236 = vmatprep.subr.bf16.mxu1 %v2554_v2  ;;  %v2006_v1 = vcombine.low %v2575_v51, %v637_v21  ;;  %v900_v3 = vrot.slane %v898_v53, 4  ;;  %v903_v4 = vrot.slane %v901_v12, 5  ;;  %v909_v25 = vrot.slane %v907_v54, 5  ;;  %v2045_v53 = vld [vmem:[%s2399_s30 + $0x40] sm:$0xf] }
  0x2f   : > { %2229 = vmatmul.mubr.msk.bf16.vlgmr.msra.gmra.mxu0 %vm398_vm2, %v2004_v23  ;;  %v890_v62 = vor.u32 %v889_v56, %v886_v55  ;;  %v912_v63 = vshrl.u32 %v2035_v44, 16  ;;  %v915_v0 = vshll.u32 %v2035_v44, 16  ;;  %v921_v8 = vshll.u32 %v2567_v45, 16  ;;  %v2043_v44 = vld [vmem:[%s2399_s30 + $0x38] sm:$0xf] }
  0x30   : > { %2247 = vmatpush3.bf16.msra.mxu0 %v2313_v10  ;;  %2232 = vmatprep.mubr.msk.bf16.mxu0 %vm398_vm2, %v2005_v40  ;;  %v904_v11 = vor.u32 %v903_v4, %v900_v3  ;;  %v926_v17 = vshrl.u32 %v2037_v50, 16  ;;  %v929_v18 = vshll.u32 %v2037_v50, 16  ;;  %v935_v22 = vshll.u32 %v2586_v58, 16  ;;  %v2041_v10 = vld [vmem:[%s2399_s30 + $0x30] sm:$0xf] }
  0x31   : > { %v891_v13 = vrot.slane %v890_v62, 4  ;;  %v914_v27 = vrot.slane %v912_v63, 4  ;;  %v917_v28 = vrot.slane %v915_v0, 5  ;;  %v923_v30 = vrot.slane %v921_v8, 5  ;;  %2266 = vmatprep.subr.bf16.mxu0 %v2591_v59  ;;  %v2619_v40 = vld [vmem:[%s2399_s30 + $0x34] sm:$0x1] }
  0x32   : > { %v905_v6 = vrot.slane %v904_v11, 4  ;;  %v928_v14 = vrot.slane %v926_v17, 4  ;;  %v931_v32 = vrot.slane %v929_v18, 5  ;;  %v937_v19 = vrot.slane %v935_v22, 5  ;;  %v2639_v12 = vld [vmem:[%s2399_s30 + $0x44] sm:$0x1] }
  0x33   : > { %v896_v35 = vsel %vm2442_vm3, %v891_v13, %v895_v57  ;;  %v918_v23 = vor.u32 %v917_v28, %v914_v27  ;;  %v940_v49 = vshrl.u32 %v2039_v9, 16  ;;  %v943_v29 = vshll.u32 %v2039_v9, 16  ;;  %v2059_v9 = vld [vmem:[%s2399_s30 + $0x10] sm:$0xe] }
  0x34   : > { %2219 = vmatmul.mubr.msk.bf16.vlgmr.msra.gmra.mxu1 %vm398_vm2, %v1985_v61  ;;  %v910_v37 = vsel %vm2442_vm3, %v905_v6, %v909_v25  ;;  %v932_v39 = vor.u32 %v931_v32, %v928_v14  ;;  %v949_v42 = vshll.u32 %v2606_v5, 16  ;;  %v954_v43 = vshrl.u32 %v2041_v10, 16  ;;  %v2058_v25 = vld [vmem:[%s2399_s30 + $0x8] sm:$0xe] }
  0x35   : > { %2237 = vmatpush3.bf16.msra.mxu1 %v2554_v2  ;;  %2222 = vmatprep.mubr.msk.bf16.mxu1 %vm398_vm2, %v1986_v26  ;;  %v2049_v36 = vcombine.low %v896_v35, %v910_v37  ;;  %v919_v41 = vrot.slane %v918_v23, 4  ;;  %v942_v61 = vrot.slane %v940_v49, 4  ;;  %v945_v46 = vrot.slane %v943_v29, 5  ;;  %v2061_v23 = vld [vmem:[%s2399_s30 + $0x20] sm:$0xe] }
  0x36   : > { %2256 = vmatprep.subr.bf16.mxu1 %v2602_v16  ;;  %v933_v24 = vrot.slane %v932_v39, 4  ;;  %v951_v48 = vrot.slane %v949_v42, 5  ;;  %v956_v50 = vrot.slane %v954_v43, 4  ;;  %v957_v51 = vshll.u32 %v2041_v10, 16  ;;  %v2657_v10 = vld [vmem:[%s2936_s1 + $0x40] sm:$0xff]  }
  0x37   : > { %2233 = vmatmul.mubr.msk.bf16.gmra.mxu0 %vm398_vm2, %v2006_v1  ;;  %v924_v20 = vsel %vm2442_vm3, %v919_v41, %v923_v30  ;;  %v946_v26 = vor.u32 %v945_v46, %v942_v61  ;;  %v963_v2 = vshll.u32 %v2619_v40, 16  ;;  %v968_v54 = vshrl.u32 %v2043_v44, 16  ;;  %v2320_v29 = vld [vmem:[%s2399_s30 + $0x28] ss:$8 sps:$4 sm:$0xff]  }
  0x38   : > { %2248 = vmatprep.mubr.msk.bf16.mxu0 %vm398_vm2, %v2049_v36  ;;  %v938_v21 = vsel %vm2442_vm3, %v933_v24, %v937_v19  ;;  %v959_v55 = vrot.slane %v957_v51, 5  ;;  %v971_v56 = vshll.u32 %v2043_v44, 16  ;;  %v977_v57 = vshll.u32 %v2629_v47, 16  ;;  %v2322_v46 = vld [vmem:[%s2399_s30 + $0x10] ss:$8 sps:$4 sm:$0xff]  }
  0x39   : > { %v2050_v1 = vcombine.low %v924_v20, %v938_v21  ;;  %v947_v3 = vrot.slane %v946_v26, 4  ;;  %v970_v4 = vrot.slane %v968_v54, 4  ;;  %v965_v63 = vrot.slane %v963_v2, 5  ;;  %v2064_v2 = vld [vmem:[%s2399_s30 + $0x38] sm:$0xe] }
  0x3a   : > { %v960_v62 = vor.u32 %v959_v55, %v956_v50  ;;  %v973_v0 = vrot.slane %v971_v56, 5  ;;  %v982_v8 = vshrl.u32 %v2045_v53, 16  ;;  %v979_v17 = vrot.slane %v977_v57, 5  ;;  %v2065_v54 = vld [vmem:[%s2399_s30 + $0x40] sm:$0xe] }
  0x3b   : > { %v952_v11 = vsel %vm2442_vm3, %v947_v3, %v951_v48  ;;  %v985_v18 = vshll.u32 %v2045_v53, 16  ;;  %v991_v22 = vshll.u32 %v2639_v12, 16  ;;  %v2066_v30 = vrot.slane %v2058_v25, 9  ;;  %v2104_v3 = vld [vmem:[%s2399_s30 + $0x10] sm:$0xf] }
  0x3c   : > { %2223 = vmatmul.mubr.msk.bf16.gmra.mxu1 %vm398_vm2, %v1987_v33  ;;  %v961_v13 = vrot.slane %v960_v62, 4  ;;  %v974_v27 = vor.u32 %v973_v0, %v970_v4  ;;  %v984_v28 = vrot.slane %v982_v8, 4  ;;  %v1127_v14 = vrot.slane %v2546_v34, 5  ;;  %v2318_v33 = vld [vmem:[%s2399_s30 + $0x18] ss:$8 sps:$4 sm:$0xff]  }
  0x3d   : > { %2238 = vmatprep.mubr.msk.bf16.mxu1 %vm398_vm2, %v2316_v15  ;;  %v987_v6 = vrot.slane %v985_v18, 5  ;;  %v2067_v32 = vrot.slane %v2059_v9, 9  ;;  %v1131_v60 = vrot.slane %v2562_v38, 5  ;;  %v2068_v49 = vrot.slane %v2060_v7, 9  ;;  %v2106_v25 = vld [vmem:[%s2399_s30 + $0x18] sm:$0xf] }
  0x3e   : > { %v966_v19 = vsel %vm2442_vm3, %v961_v13, %v965_v63  ;;  %v975_v35 = vrot.slane %v974_v27, 4  ;;  %v993_v34 = vrot.slane %v991_v22, 5  ;;  %v1135_v42 = vrot.slane %v2567_v45, 5  ;;  %v2682_v45 = vld [vmem:[%s2936_s1 + $0x38] sm:$0xff]   ;;  %v2131_v18 = vld [vmem:[%s2399_s30 + $0x10] sm:$0xe] }
  0x3f   : > { %2249 = vmatmul.mubr.msk.bf16.vlgmr.msra.gmra.mxu0 %vm398_vm2, %v2050_v1  ;;  %v2051_v37 = vcombine.low %v952_v11, %v966_v19  ;;  %v988_v39 = vor.u32 %v987_v6, %v984_v28  ;;  %v2069_v38 = vrot.slane %v2061_v23, 9  ;;  %v1139_v43 = vrot.slane %v2586_v58, 5  ;;  %v2062_v58 = vld [vmem:[%s2399_s30 + $0x28] sm:$0xe]  ;;  %v2107_v62 = vld [vmem:[%s2399_s30 + $0x1c] sm:$0x1] }
  0x40   : > { %2267 = vmatpush3.bf16.msra.mxu0 %v2591_v59  ;;  %v980_v44 = vsel %vm2442_vm3, %v975_v35, %v979_v17  ;;  %v2677_v41 = vsel %vm2508_vm6, %v2066_v30, %v1127_v14  ;;  %v2063_v59 = vld [vmem:[%s2399_s30 + $0x30] sm:$0xe]  ;;  %v2689_v61 = vsel %vm2508_vm6, %v2067_v32, %v1131_v60  ;;  %v2694_v24 = vsel %vm2508_vm6, %v2068_v49, %v1135_v42  ;;  %v2324_v22 = vld [vmem:[%s2399_s30 + $0x20] ss:$8 sps:$4 sm:$0xff]   ;;  %v2132_v30 = vld [vmem:[%s2399_s30 + $0x18] sm:$0xe] }
  0x41   : > { %2252 = vmatprep.mubr.msk.bf16.mxu0 %vm398_vm2, %v2051_v37  ;;  %v989_v36 = vrot.slane %v988_v39, 4  ;;  %2286 = vmatprep.subr.bf16.mxu0 %v2657_v10  ;;  %v2070_v48 = vrot.slane %v2062_v58, 9  ;;  %v1143_v50 = vrot.slane %v2606_v5, 5  ;;  %v2701_v15 = vsel %vm2508_vm6, %v2069_v38, %v1139_v43  ;;  %v2326_v14 = vld [vmem:[%s2399_s30 + $0x30] ss:$8 sps:$4 sm:$0xff]  }
  0x42   : > { %v2071_v20 = vrot.slane %v2063_v59, 9  ;;  %v1147_v26 = vrot.slane %v2619_v40, 5  ;;  %v2072_v21 = vrot.slane %v2064_v2, 9  ;;  %v1151_v5 = vrot.slane %v2629_v47, 5  ;;  %v2321_v40 = vld [vmem:[%s2399_s30 + $0x38] ss:$8 sps:$4 sm:$0xff]  }
  0x43   : > { %v994_v51 = vsel %vm2442_vm3, %v989_v36, %v993_v34  ;;  %v2073_v55 = vrot.slane %v2065_v54, 9  ;;  %v1155_v56 = vrot.slane %v2639_v12, 5  ;;  %v2076_v57 = vcombine.low %v2677_v41, %v2689_v61  ;;  %v2105_v47 = vld [vmem:[%s2399_s30 + $0x14] sm:$0x1]  ;;  %v2108_v19 = vld [vmem:[%s2399_s30 + $0x20] sm:$0xf] }
  0x44   : > { %2239 = vmatmul.mubr.msk.bf16.vlgmr.msra.gmra.mxu1 %vm398_vm2, %v2318_v33  ;;  %v2052_v53 = vcombine.low %v980_v44, %v994_v51  ;;  %v2077_v1 = vcombine.low %v2694_v24, %v2701_v15  ;;  %v2726_v12 = vsel %vm2508_vm6, %v2071_v20, %v1147_v26  ;;  %v2730_v4 = vsel %vm2508_vm6, %v2072_v21, %v1151_v5  ;;  %v2109_v37 = vld [vmem:[%s2399_s30 + $0x24] sm:$0x1]  ;;  %v2110_v42 = vld [vmem:[%s2399_s30 + $0x28] sm:$0xf]  ;;  %v2111_v38 = vld [vmem:[%s2399_s30 + $0x2c] sm:$0x1] }
  0x45   : > { %2257 = vmatpush3.bf16.msra.mxu1 %v2602_v16  ;;  %2242 = vmatprep.mubr.msk.bf16.mxu1 %vm398_vm2, %v2320_v29  ;;  %v2719_v16 = vsel %vm2508_vm6, %v2070_v48, %v1143_v50  ;;  %v1403_v63 = vshrl.u32 %v2104_v3, 16  ;;  %v1406_v0 = vshll.u32 %v2104_v3, 16  ;;  %v2737_v8 = vsel %vm2508_vm6, %v2073_v55, %v1155_v56  ;;  %v2133_v61 = vld [vmem:[%s2399_s30 + $0x20] sm:$0xe]  ;;  %v2134_v20 = vld [vmem:[%s2399_s30 + $0x28] sm:$0xe] }
  0x46   : > { %2276 = vmatprep.subr.bf16.mxu1 %v2682_v45  ;;  %v1412_v9 = vshll.u32 %v2105_v47, 16  ;;  %v1417_v11 = vshrl.u32 %v2106_v25, 16  ;;  %v1420_v17 = vshll.u32 %v2106_v25, 16  ;;  %v1426_v28 = vshll.u32 %v2107_v62, 16  ;;  %v2112_v21 = vld [vmem:[%s2399_s30 + $0x30] sm:$0xf] }
  0x47   : > { %2253 = vmatmul.mubr.msk.bf16.gmra.mxu0 %vm398_vm2, %v2052_v53  ;;  %v1405_v13 = vrot.slane %v1403_v63, 4  ;;  %v1408_v27 = vrot.slane %v1406_v0, 5  ;;  %v2139_v6 = vrot.slane %v2131_v18, 9  ;;  %v1646_v33 = vrot.slane %v2105_v47, 5  ;;  %v2114_v25 = vld [vmem:[%s2399_s30 + $0x38] sm:$0xf] }
  0x48   : > { %2268 = vmatprep.mubr.msk.bf16.mxu0 %vm398_vm2, %v2322_v46  ;;  %v1414_v32 = vrot.slane %v1412_v9, 5  ;;  %v1419_v60 = vrot.slane %v1417_v11, 4  ;;  %v1422_v7 = vrot.slane %v1420_v17, 5  ;;  %v1428_v23 = vrot.slane %v1426_v28, 5  ;;  %v2115_v18 = vld [vmem:[%s2399_s30 + $0x3c] sm:$0x1] }
  0x49   : > { %v1409_v35 = vor.u32 %v1408_v27, %v1405_v13  ;;  %v2140_v49 = vrot.slane %v2132_v30, 9  ;;  %v1650_v29 = vrot.slane %v2107_v62, 5  ;;  %v2078_v39 = vcombine.low %v2719_v16, %v2726_v12  ;;  %v2327_v62 = vld [vmem:[%s2399_s30 + $0x40] ss:$8 sps:$4 sm:$0xff]   ;;  %v2135_v27 = vld [vmem:[%s2399_s30 + $0x30] sm:$0xe] }
  0x4a   : > { %v1423_v34 = vor.u32 %v1422_v7, %v1419_v60  ;;  %v1431_v43 = vshrl.u32 %v2108_v19, 16  ;;  %v1434_v44 = vshll.u32 %v2108_v19, 16  ;;  %v2079_v36 = vcombine.low %v2730_v4, %v2737_v8 }
  0x4b   : > { %v1410_v41 = vrot.slane %v1409_v35, 4  ;;  %v1440_v58 = vshll.u32 %v2109_v37, 16  ;;  %v1445_v59 = vshrl.u32 %v2110_v42, 16  ;;  %v1647_v48 = vsel %vm2508_vm6, %v2139_v6, %v1646_v33 }
  0x4c   : > { %2243 = vmatmul.mubr.msk.bf16.gmra.mxu1 %vm398_vm2, %v2321_v40  ;;  %v1424_v46 = vrot.slane %v1423_v34, 4  ;;  %v1433_v50 = vrot.slane %v1431_v43, 4  ;;  %v1436_v51 = vrot.slane %v1434_v44, 5  ;;  %v1651_v2 = vsel %vm2508_vm6, %v2140_v49, %v1650_v29  ;;  %v2117_v44 = vld [vmem:[%s2399_s30 + $0x44] sm:$0x1] }
  0x4d   : > { %2258 = vmatprep.mubr.msk.bf16.mxu1 %vm398_vm2, %v2076_v57  ;;  %v1415_v26 = vsel %vm2442_vm3, %v1410_v41, %v1414_v32  ;;  %v1447_v53 = vrot.slane %v1445_v59, 4  ;;  %v1448_v54 = vshll.u32 %v2110_v42, 16  ;;  %v1454_v56 = vshll.u32 %v2111_v38, 16  ;;  %v2113_v57 = vld [vmem:[%s2399_s30 + $0x34] sm:$0x1] }
  0x4e   : > { %v1429_v5 = vsel %vm2442_vm3, %v1424_v46, %v1428_v23  ;;  %v1437_v55 = vor.u32 %v1436_v51, %v1433_v50  ;;  %v2141_v40 = vrot.slane %v2133_v61, 9  ;;  %v2768_v16 = vrot.slane %v1440_v58, 5  ;;  %v2136_v32 = vld [vmem:[%s2399_s30 + $0x38] sm:$0xe]  ;;  %v2116_v23 = vld [vmem:[%s2399_s30 + $0x40] sm:$0xf] }
  0x4f   : > { %2269 = vmatmul.mubr.msk.bf16.vlgmr.msra.gmra.mxu0 %vm398_vm2, %v2324_v22  ;;  %v1450_v3 = vrot.slane %v1448_v54, 5  ;;  %v1654_v47 = vrot.slane %v2109_v37, 5  ;;  %v2142_v12 = vrot.slane %v2134_v20, 9  ;;  %v1658_v0 = vrot.slane %v2111_v38, 5  ;;  %v2119_v51 = vld [vmem:[%s2399_s30 + $0x4c] sm:$0x1] }
  0x50   : > { %2287 = vmatpush3.bf16.msra.mxu0 %v2657_v10  ;;  %2272 = vmatprep.mubr.msk.bf16.mxu0 %vm398_vm2, %v2326_v14  ;;  %v2149_v10 = vcombine.low %v1647_v48, %v1651_v2  ;;  %v2772_v63 = vrot.slane %v1437_v55, 4  ;;  %v1459_v9 = vshrl.u32 %v2112_v21, 16  ;;  %v2122_v11 = vcombine.low %v1415_v26, %v1429_v5  ;;  %v2137_v26 = vld [vmem:[%s2399_s30 + $0x40] sm:$0xe]  ;;  %v2138_v5 = vld [vmem:[%s2399_s30 + $0x48] sm:$0xe] }
  0x51   : > { %v1451_v17 = vor.u32 %v1450_v3, %v1447_v53  ;;  %v1462_v22 = vshll.u32 %v2112_v21, 16  ;;  %v1468_v13 = vshll.u32 %v2113_v57, 16  ;;  %v1456_v28 = vrot.slane %v1454_v56, 5 }
  0x52   : > { %v1655_v30 = vsel %vm2508_vm6, %v2141_v40, %v1654_v47  ;;  %v1461_v6 = vrot.slane %v1459_v9, 4  ;;  %v1473_v14 = vshrl.u32 %v2114_v25, 16  ;;  %v1443_v24 = vsel %vm2442_vm3, %v2772_v63, %v2768_v16 }
  0x53   : > { %v1452_v15 = vrot.slane %v1451_v17, 4  ;;  %v1464_v60 = vrot.slane %v1462_v22, 5  ;;  %v1476_v33 = vshll.u32 %v2114_v25, 16  ;;  %v1482_v19 = vshll.u32 %v2115_v18, 16 }
  0x54   : > { %2259 = vmatmul.mubr.msk.bf16.vlgmr.msra.gmra.mxu1 %vm398_vm2, %v2077_v1  ;;  %v1659_v1 = vsel %vm2508_vm6, %v2142_v12, %v1658_v0  ;;  %v1475_v7 = vrot.slane %v1473_v14, 4  ;;  %v2143_v35 = vrot.slane %v2135_v27, 9  ;;  %v1470_v49 = vrot.slane %v1468_v13, 5 }
  0x55   : > { %2277 = vmatpush3.bf16.msra.mxu1 %v2682_v45  ;;  %2262 = vmatprep.mubr.msk.bf16.mxu1 %vm398_vm2, %v2078_v39  ;;  %v1465_v45 = vor.u32 %v1464_v60, %v1461_v6  ;;  %v1662_v29 = vrot.slane %v2113_v57, 5  ;;  %v2144_v37 = vrot.slane %v2136_v32, 9  ;;  %v2118_v39 = vld [vmem:[%s2399_s30 + $0x48] sm:$0xf]  ;;  %v1457_v34 = vsel %vm2442_vm3, %v1452_v15, %v1456_v28  ;;  %s239_s30 = scalar_lea.vmem %s2939_s4, %s2386_s24 }
  0x56   : > { %v2150_v42 = vcombine.low %v1655_v30, %v1659_v1  ;;  %v1478_v38 = vrot.slane %v1476_v33, 5  ;;  %v1666_v43 = vrot.slane %v2115_v18, 5  ;;  %v1487_v59 = vshrl.u32 %v2116_v23, 16 }
  0x57   : > { %2273 = vmatmul.mubr.msk.bf16.gmra.mxu0 %vm398_vm2, %v2327_v62  ;;  %v1466_v41 = vrot.slane %v1465_v45, 4  ;;  %v1663_v58 = vsel %vm2508_vm6, %v2143_v35, %v1662_v29  ;;  %v1490_v61 = vshll.u32 %v2116_v23, 16  ;;  %v1484_v48 = vrot.slane %v1482_v19, 5 }
  0x58   : > { %2288 = vmatprep.mubr.msk.bf16.mxu0 %vm398_vm2, %v2149_v10  ;;  %v1479_v46 = vor.u32 %v1478_v38, %v1475_v7  ;;  %v1667_v50 = vsel %vm2508_vm6, %v2144_v37, %v1666_v43  ;;  %v1501_v20 = vshrl.u32 %v2118_v39, 16  ;;  %v1489_v53 = vrot.slane %v1487_v59, 4 }
  0x59   : > { %v1471_v2 = vsel %vm2442_vm3, %v1466_v41, %v1470_v49  ;;  %v1492_v54 = vrot.slane %v1490_v61, 5  ;;  %v1496_v21 = vshll.u32 %v2117_v44, 16  ;;  %v2151_v56 = vcombine.low %v1663_v58, %v1667_v50 }
  0x5a   : > { %v1480_v55 = vrot.slane %v1479_v46, 4  ;;  %v1503_v40 = vrot.slane %v1501_v20, 4  ;;  %v1504_v57 = vshll.u32 %v2118_v39, 16  ;;  %v1510_v3 = vshll.u32 %v2119_v51, 16 }
  0x5b   : > { %v1493_v16 = vor.u32 %v1492_v54, %v1489_v53  ;;  %v2145_v47 = vrot.slane %v2137_v26, 9  ;;  %v1670_v12 = vrot.slane %v2117_v44, 5  ;;  %v2146_v10 = vrot.slane %v2138_v5, 9 }
  0x5c   : > { %2263 = vmatmul.mubr.msk.bf16.gmra.mxu1 %vm398_vm2, %v2079_v36  ;;  %v1485_v25 = vsel %vm2442_vm3, %v1480_v55, %v1484_v48  ;;  %v1506_v62 = vrot.slane %v1504_v57, 5  ;;  %v1674_v63 = vrot.slane %v2119_v51, 5  ;;  %v2123_v4 = vcombine.low %v1443_v24, %v1457_v34 }
  0x5d   : > { %2278 = vmatprep.mubr.msk.bf16.mxu1 %vm398_vm2, %v2122_v11  ;;  %v1671_v36 = vsel %vm2508_vm6, %v2145_v47, %v1670_v12  ;;  %v2124_v9 = vcombine.low %v1471_v2, %v1485_v25  ;;  %v1494_v11 = vrot.slane %v1493_v16, 4  ;;  %v1498_v17 = vrot.slane %v1496_v21, 5 }
  0x5e   : > { %v1507_v8 = vor.u32 %v1506_v62, %v1503_v40  ;;  %v1675_v0 = vsel %vm2508_vm6, %v2146_v10, %v1674_v63  ;;  %v1512_v18 = vrot.slane %v1510_v3, 5 }
  0x5f   : > { %2289 = vmatmul.mubr.msk.bf16.vlgmr.msra.gmra.mxu0 %vm398_vm2, %v2150_v42  ;;  %v2152_v13 = vcombine.low %v1671_v36, %v1675_v0  ;;  %v1499_v27 = vsel %vm2442_vm3, %v1494_v11, %v1498_v17 }
  0x60   : > { %2292 = vmatprep.mubr.msk.bf16.mxu0 %vm398_vm2, %v2151_v56  ;;  %v1508_v22 = vrot.slane %v1507_v8, 4 }
  0x62   : > { %v1513_v28 = vsel %vm2442_vm3, %v1508_v22, %v1512_v18 }
  0x63   : > { %v2125_v52 = vcombine.low %v1499_v27, %v1513_v28 }
  0x64   : > { %2279 = vmatmul.mubr.msk.bf16.vlgmr.msra.gmra.mxu1 %vm398_vm2, %v2123_v4 }
  0x65   : > { %2282 = vmatprep.mubr.msk.bf16.mxu1 %vm398_vm2, %v2124_v9 }
  0x67   : > { %2293 = vmatmul.mubr.msk.bf16.gmra.mxu0 %vm398_vm2, %v2152_v13 }
  0x6c   : > { %2283 = vmatmul.mubr.msk.bf16.gmra.mxu1 %vm398_vm2, %v2125_v52 }
  0xe7   : > { %v2210_v30 = vpop.f32.mrf.mxu0 }
  0xe9   : > { %v445_v6 = vpop.f32.mrf.mxu0 }
  0xeb   : > { %v2211_v14 = vpop.f32.mrf.mxu0 }
  0xec   : > { %v2214_v32 = vpop.f32.mrf.mxu1 }
  0xed   : > { %v448_v24 = vpop.f32.mrf.mxu0 }
  0xee   : > { %v461_v15 = vpop.f32.mrf.mxu1 }
  0xef   : > { %v2230_v1 = vpop.f32.mrf.mxu0 }
  0xf0   : > { %v2215_v60 = vpop.f32.mrf.mxu1 }
  0xf1   : > { %v705_v7 = vpop.f32.mrf.mxu0 }
  0xf2   : > { %v2828_v33 = vpop.f32.mrf.mxu1 }
  0xf3   : > { %v2231_v19 = vpop.f32.mrf.mxu0 }
  0xf4   : > { %v2220_v35 = vpop.f32.mrf.mxu1 }
  0xf5   : > { %v708_v31 = vpop.f32.mrf.mxu0  ;;  %v557_v57 = vadd.f32 %v2220_v35, %v2210_v30 }
  0xf6   : > { %v548_v23 = vpop.f32.mrf.mxu1 }
  0xf7   : > { %v2234_v45 = vpop.f32.mrf.mxu0  ;;  %v549_v47 = vadd.f32 %v548_v23, %v445_v6  ;;  %v738_v62 = vadd.f32 %v2230_v1, %v557_v57 }
  0xf8   : > { %v2221_v49 = vpop.f32.mrf.mxu1 }
  0xf9   : > { %v721_v29 = vpop.f32.mrf.mxu0  ;;  %v560_v10 = vadd.f32 %v2221_v49, %v2211_v14  ;;  %v736_v8 = vadd.f32 %v705_v7, %v549_v47 }
  0xfa   : > { %v551_v37 = vpop.f32.mrf.mxu1 }
  0xfb   : > { %v2830_v39 = vpop.f32.mrf.mxu0  ;;  %v552_v9 = vadd.f32 %v551_v37, %v448_v24  ;;  %v739_v17 = vadd.f32 %v2231_v19, %v560_v10 }
  0xfc   : > { %v2224_v34 = vpop.f32.mrf.mxu1 }
  0xfd   : > { %v2832_v42 = vpop.f32.mrf.mxu0  ;;  %v573_v13 = vadd.f32 %v2224_v34, %v2214_v32  ;;  %v737_v14 = vadd.f32 %v708_v31, %v552_v9 }
  0xfe   : > { %v564_v38 = vpop.f32.mrf.mxu1 }
  0xff   : > { %v2250_v43 = vpop.f32.mrf.mxu0  ;;  %v565_v27 = vadd.f32 %v564_v38, %v461_v15  ;;  %v742_v23 = vadd.f32 %v2234_v45, %v573_v13 }
 0x100   : > { %v2225_v44 = vpop.f32.mrf.mxu1 }
 0x101   : > { %v1062_v41 = vpop.f32.mrf.mxu0  ;;  %v576_v24 = vadd.f32 %v2225_v44, %v2215_v60  ;;  %v740_v49 = vadd.f32 %v721_v29, %v565_v27 }
 0x102   : > { %v567_v58 = vpop.f32.mrf.mxu1 }
 0x103   : > { %v2251_v59 = vpop.f32.mrf.mxu0  ;;  %v568_v37 = vadd.f32 %v567_v58, %v2828_v33  ;;  %v743_v31 = vadd.f32 %v2830_v39, %v576_v24 }
 0x104   : > { %v2240_v61 = vpop.f32.mrf.mxu1 }
 0x105   : > { %v1065_v46 = vpop.f32.mrf.mxu0  ;;  %v861_v36 = vadd.f32 %v2240_v61, %v738_v62  ;;  %v741_v33 = vadd.f32 %v2832_v42, %v568_v37 }
 0x106   : > { %v828_v48 = vpop.f32.mrf.mxu1 }
 0x107   : > { %v2834_v50 = vpop.f32.mrf.mxu0  ;;  %v859_v18 = vadd.f32 %v828_v48, %v736_v8  ;;  %v1095_v52 = vadd.f32 %v2250_v43, %v861_v36 }
 0x108   : > { %v2241_v51 = vpop.f32.mrf.mxu1 }
 0x109   : > { %v2836_v20 = vpop.f32.mrf.mxu0  ;;  %v862_v30 = vadd.f32 %v2241_v51, %v739_v17  ;;  %v1093_v7 = vadd.f32 %v1062_v41, %v859_v18 }
 0x10a   : > { %v831_v26 = vpop.f32.mrf.mxu1 }
 0x10b   : > { %v2838_v2 = vpop.f32.mrf.mxu0  ;;  %v860_v32 = vadd.f32 %v831_v26, %v737_v14  ;;  %v1096_v34 = vadd.f32 %v2251_v59, %v862_v30 }
 0x10c   : > { %v2244_v53 = vpop.f32.mrf.mxu1 }
 0x10d   : > { %v2840_v54 = vpop.f32.mrf.mxu0  ;;  %v865_v60 = vadd.f32 %v2244_v53, %v742_v23  ;;  %v1094_v29 = vadd.f32 %v1065_v46, %v860_v32  ;;  %v2870_v53 = vld [vmem:[%s2937_s2] ss:$0 sm:$0xff] }
 0x10e   : > { %v844_v21 = vpop.f32.mrf.mxu1 }
 0x10f   : > { %v2270_v5 = vpop.f32.mrf.mxu0  ;;  %v863_v44 = vadd.f32 %v844_v21, %v740_v49 }
 0x110   : > { %v2245_v55 = vpop.f32.mrf.mxu1 }
 0x111   : > { %v1347_v56 = vpop.f32.mrf.mxu0  ;;  %v866_v51 = vadd.f32 %v2245_v55, %v743_v31  ;;  %v1097_v47 = vadd.f32 %v2836_v20, %v863_v44 }
 0x112   : > { %v847_v40 = vpop.f32.mrf.mxu1 }
 0x113   : > { %v2271_v16 = vpop.f32.mrf.mxu0  ;;  %v864_v46 = vadd.f32 %v847_v40, %v741_v33  ;;  %v1100_v42 = vadd.f32 %v2838_v2, %v866_v51 }
 0x114   : > { %v2260_v3 = vpop.f32.mrf.mxu1 }
 0x115   : > { %v2842_v12 = vpop.f32.mrf.mxu0  ;;  %v1257_v19 = vadd.f32 %v2260_v3, %v1095_v52  ;;  %v1099_v3 = vadd.f32 %v2834_v50, %v865_v60  ;;  %v1098_v2 = vadd.f32 %v2840_v54, %v864_v46 }
 0x116   : > { %v1224_v25 = vpop.f32.mrf.mxu1 }
 0x117   : > { %v2844_v63 = vpop.f32.mrf.mxu0  ;;  %v1255_v38 = vadd.f32 %v1224_v25, %v1093_v7  ;;  %v1380_v61 = vadd.f32 %v2270_v5, %v1257_v19 }
 0x118   : > { %v2261_v4 = vpop.f32.mrf.mxu1 }
 0x119   : > { %v2846_v0 = vpop.f32.mrf.mxu0  ;;  %v1258_v48 = vadd.f32 %v2261_v4, %v1096_v34  ;;  %v1378_v58 = vadd.f32 %v1347_v56, %v1255_v38 }
 0x11a   : > { %v1227_v11 = vpop.f32.mrf.mxu1 }
 0x11b   : > { %v2849_v22 = vpop.f32.mrf.mxu0  ;;  %v1256_v39 = vadd.f32 %v1227_v11, %v1094_v29  ;;  %v1381_v5 = vadd.f32 %v2271_v16, %v1258_v48 }
 0x11c   : > { %v2264_v28 = vpop.f32.mrf.mxu1 }
 0x11d   : > { %v2851_v6 = vpop.f32.mrf.mxu0  ;;  %v1261_v56 = vadd.f32 %v2264_v28, %v1099_v3  ;;  %v1379_v4 = vadd.f32 %v2842_v12, %v1256_v39 }
 0x11e   : > { %v1240_v1 = vpop.f32.mrf.mxu1 }
 0x11f   : > { %v2290_v35 = vpop.f32.mrf.mxu0  ;;  %v1259_v20 = vadd.f32 %v1240_v1, %v1097_v47  ;;  %v1384_v17 = vadd.f32 %v2844_v63, %v1261_v56 }
 0x120   : > { %v2265_v15 = vpop.f32.mrf.mxu1 }
 0x121   : > { %v1743_v43 = vpop.f32.mrf.mxu0  ;;  %v1262_v36 = vadd.f32 %v2265_v15, %v1100_v42  ;;  %v1382_v27 = vadd.f32 %v2846_v0, %v1259_v20 }
 0x122   : > { %v1243_v41 = vpop.f32.mrf.mxu1 }
 0x123   : > { %v2291_v45 = vpop.f32.mrf.mxu0  ;;  %v1260_v28 = vadd.f32 %v1243_v41, %v1098_v2  ;;  %v1385_v24 = vadd.f32 %v2849_v22, %v1262_v36 }
 0x124   : > { %v2280_v26 = vpop.f32.mrf.mxu1 }
 0x125   : > { %v1614_v59 = vadd.f32 %v2280_v26, %v1380_v61  ;;  %v1746_v57 = vpop.f32.mrf.mxu0 }
 0x126   : > { %v1581_v21 = vpop.f32.mrf.mxu1 }
 0x127   : > { %v1776_v55 = vadd.f32 %v2290_v35, %v1614_v59  ;;  %v1612_v25 = vadd.f32 %v1581_v21, %v1378_v58  ;;  %v2294_v16 = vpop.f32.mrf.mxu0  ;;  %v1383_v35 = vadd.f32 %v2851_v6, %v1260_v28 }
 0x128   : > { %v2281_v50 = vpop.f32.mrf.mxu1 }
 0x129   : > { %v1791_v62 = vadd.f32 %v2870_v53, %v1776_v55  ;;  %v1774_v10 = vadd.f32 %v1743_v43, %v1612_v25  ;;  %v1615_v40 = vadd.f32 %v2281_v50, %v1381_v5  ;;  %v1759_v52 = vpop.f32.mrf.mxu0 }
 0x12a   : > { %v1584_v8 = vpop.f32.mrf.mxu1 }
 0x12b   : > { %1800 = vst.msk [vmem:[%s2876_s27 + $0x10] sm:$0xff] %vm1797_vm7, %v1791_v62  ;;  %v1789_v9 = vadd.f32 %v2870_v53, %v1774_v10  ;;  %v1777_v11 = vadd.f32 %v2291_v45, %v1615_v40  ;;  %v1613_v18 = vadd.f32 %v1584_v8, %v1379_v4  ;;  %v1831_v23 = vmul.f32 %v1791_v62, %v1791_v62  ;;  %v2295_v15 = vpop.f32.mrf.mxu0 }
 0x12c   : > { %v2284_v13 = vpop.f32.mrf.mxu1  ;;  %v1809_v41 = vsel %vm1797_vm7, %v1791_v62, 0.0 }
 0x12d   : > { %1798 = vst.msk [vmem:[%s2876_s27] sm:$0xff] %vm1797_vm7, %v1789_v9  ;;  %v1792_v12 = vadd.f32 %v2870_v53, %v1777_v11  ;;  %v1775_v54 = vadd.f32 %v1746_v57, %v1613_v18  ;;  %v1618_v30 = vadd.f32 %v2284_v13, %v1384_v17  ;;  %v1829_v63 = vmul.f32 %v1789_v9, %v1789_v9  ;;  %v1762_v33 = vpop.f32.mrf.mxu0 }
 0x12e   : > { %v1597_v14 = vpop.f32.mrf.mxu1  ;;  %v1806_v37 = vsel %vm1797_vm7, %v1789_v9, 0.0  ;;  %v1840_v29 = vsel %vm1797_vm7, %v1831_v23, 0.0 }
 0x12f   : > { %1801 = vst.msk [vmem:[%s2876_s27 + $0x18] sm:$0xff] %vm1797_vm7, %v1792_v12  ;;  %v1616_v1 = vadd.f32 %v1597_v14, %v1382_v27  ;;  %v1790_v7 = vadd.f32 %v2870_v53, %v1775_v54  ;;  %v1780_v19 = vadd.f32 %v2294_v16, %v1618_v30  ;;  %v1837_v61 = vsel %vm1797_vm7, %v1829_v63, 0.0 }
 0x130   : > { %v2285_v0 = vpop.f32.mrf.mxu1  ;;  %v1832_v48 = vmul.f32 %v1792_v12, %v1792_v12  ;;  %v1811_v58 = vsel %vm1797_vm7, %v1792_v12, 0.0 }
 0x131   : > { %v1778_v49 = vadd.f32 %v1759_v52, %v1616_v1  ;;  %v1619_v32 = vadd.f32 %v2285_v0, %v1385_v24  ;;  %1799 = vst.msk [vmem:[%s2876_s27 + $0x8] sm:$0xff] %vm1797_vm7, %v1790_v7  ;;  %v1807_v22 = vsel %vm1797_vm7, %v1790_v7, 0.0  ;;  %v1830_v34 = vmul.f32 %v1790_v7, %v1790_v7 }
 0x132   : > { %v1795_v38 = vadd.f32 %v2870_v53, %v1780_v19  ;;  %v1600_v43 = vpop.f32.mrf.mxu1  ;;  %v1808_v31 = vadd.f32 %v1807_v22, %v1806_v37  ;;  %v1842_v21 = vsel %vm1797_vm7, %v1832_v48, 0.0 }
 0x133   : > { %v1793_v60 = vadd.f32 %v2870_v53, %v1778_v49  ;;  %v1781_v6 = vadd.f32 %v2295_v15, %v1619_v32  ;;  %v1617_v44 = vadd.f32 %v1600_v43, %v1383_v35  ;;  %v1838_v45 = vsel %vm1797_vm7, %v1830_v34, 0.0 }
 0x134   : > { %1804 = vst.msk [vmem:[%s2876_s27 + $0x30] sm:$0xff] %vm1797_vm7, %v1795_v38  ;;  %v1810_v51 = vadd.f32 %v1809_v41, %v1808_v31  ;;  %v1839_v26 = vadd.f32 %v1838_v45, %v1837_v61  ;;  %v1835_v42 = vmul.f32 %v1795_v38, %v1795_v38  ;;  %v1817_v40 = vsel %vm1797_vm7, %v1795_v38, 0.0 }
 0x135   : > { %1802 = vst.msk [vmem:[%s2876_s27 + $0x20] sm:$0xff] %vm1797_vm7, %v1793_v60  ;;  %v1833_v59 = vmul.f32 %v1793_v60, %v1793_v60  ;;  %v1796_v57 = vadd.f32 %v2870_v53, %v1781_v6  ;;  %v1779_v3 = vadd.f32 %v1762_v33, %v1617_v44  ;;  %v1813_v46 = vsel %vm1797_vm7, %v1793_v60, 0.0 }
 0x136   : > { %v1841_v47 = vadd.f32 %v1840_v29, %v1839_v26  ;;  %v1812_v39 = vadd.f32 %v1811_v58, %v1810_v51 }
 0x137   : > { %1805 = vst.msk [vmem:[%s2876_s27 + $0x38] sm:$0xff] %vm1797_vm7, %v1796_v57  ;;  %v1794_v5 = vadd.f32 %v2870_v53, %v1779_v3  ;;  %v1844_v56 = vsel %vm1797_vm7, %v1833_v59, 0.0  ;;  %v1836_v16 = vmul.f32 %v1796_v57, %v1796_v57  ;;  %v1848_v53 = vsel %vm1797_vm7, %v1835_v42, 0.0 }
 0x138   : > { %v1814_v55 = vadd.f32 %v1813_v46, %v1812_v39  ;;  %v1843_v25 = vadd.f32 %v1842_v21, %v1841_v47  ;;  %v1819_v36 = vsel %vm1797_vm7, %v1796_v57, 0.0 }
 0x139   : > { %1803 = vst.msk [vmem:[%s2876_s27 + $0x28] sm:$0xff] %vm1797_vm7, %v1794_v5  ;;  %v1815_v50 = vsel %vm1797_vm7, %v1794_v5, 0.0  ;;  %v1834_v20 = vmul.f32 %v1794_v5, %v1794_v5  ;;  %v1850_v17 = vsel %vm1797_vm7, %v1836_v16, 0.0 }
 0x13a   : > { %v1845_v62 = vadd.f32 %v1844_v56, %v1843_v25  ;;  %v1816_v10 = vadd.f32 %v1815_v50, %v1814_v55 }
 0x13b   : > { %v1846_v4 = vsel %vm1797_vm7, %v1834_v20, 0.0 }
 0x13c   : > { %v1818_v8 = vadd.f32 %v1817_v40, %v1816_v10  ;;  %v1847_v2 = vadd.f32 %v1846_v4, %v1845_v62 }
 0x13e   : > { %v1820_v9 = vadd.f32 %v1819_v36, %v1818_v8  ;;  %v1849_v11 = vadd.f32 %v1848_v53, %v1847_v2 }
 0x140   : > { %v1821_v18 = vrot.slane %v1820_v9, 4  ;;  %v1851_v13 = vadd.f32 %v1850_v17, %v1849_v11 }
 0x142   : > { %v1822_v27 = vadd.f32 %v1821_v18, %v1820_v9  ;;  %v1852_v28 = vrot.slane %v1851_v13, 4 }
 0x144   : > { %v1823_v12 = vrot.slane %v1822_v27, 2  ;;  %v1853_v52 = vadd.f32 %v1852_v28, %v1851_v13 }
 0x146   : > { %v1824_v54 = vadd.f32 %v1823_v12, %v1822_v27  ;;  %v1854_v30 = vrot.slane %v1853_v52, 2 }
 0x148   : > { %v1825_v14 = vrot.slane %v1824_v54, 1  ;;  %v1855_v24 = vadd.f32 %v1854_v30, %v1853_v52 }
 0x14a   : > { %v1826_v1 = vadd.f32 %v1825_v14, %v1824_v54  ;;  %v1856_v63 = vrot.slane %v1855_v24, 1 }
 0x14c   : > { %1828 = vst.msk [vmem:[%s239_s30] sm:$0x1] %vm1827_vm8, %v1826_v1  ;;  %v1857_v7 = vadd.f32 %v1856_v63, %v1855_v24 }
 0x14e   : > { %1858 = vst.msk [vmem:[%s242_s8] sm:$0x1] %vm1827_vm8, %v1857_v7 }
 0x14f PF: > { %s16_s18 = sadd.s32 1, %s2334_s18  }
 0x150   : > { %p13_p5 = scmp.ge.s32.totalorder %s16_s18, 4  }
 0x152   :  { %15 = sbr.rel (!%p13_p5) target bundleno = 1 (0x1), region = 96 }

</bundles_post_ra>
